<compile_context>
chip_gen: v6e
topology: v6e:2x2x1
jax: 0.10.0
libtpu: 0.0.40
codegen_flags: <defaults>
</compile_context>

<pallas_src>
import functools

import jax
import jax.numpy as jnp
from jax.experimental import pallas as pl
from jax.experimental.pallas import tpu as pltpu


_MXU_DTYPE = jnp.bfloat16          # MXU operand dtype; accumulation stays f32

_VMEM_LIMIT_CACHE = None


def _vmem_limit_bytes():
    """Generation-aware scoped-VMEM cap: ~75% of physical, clamped to 100 MiB
    (~96 MiB on v5e/v6e's 128 MiB, ~48 MiB on v7x's 64 MiB)."""
    global _VMEM_LIMIT_CACHE
    if _VMEM_LIMIT_CACHE is None:
        try:
            cap = int(pltpu.get_tpu_info().vmem_capacity_bytes)
        except Exception:
            cap = 64 * 1024 * 1024          # conservative fallback (v7x physical)
        _VMEM_LIMIT_CACHE = min((cap * 3) // 4, 100 * 1024 * 1024)
    return _VMEM_LIMIT_CACHE


def _pick_divisor_tile(dim, desired, align):
    """Largest tile <= desired that divides dim and is a multiple of `align`;
    falls back to the full dim (always a legal block size)."""
    if dim <= desired:
        return dim
    t = (desired // align) * align
    while t >= align:
        if dim % t == 0:
            return t
        t -= align
    return dim


def _row_tile(n, desired):
    """Row (sublane) tile.  Ragged last tiles are masked by Pallas, so no
    divisibility requirement; just cap the size and keep 8-row alignment."""
    if n <= desired:
        return n
    return (desired // 8) * 8


# --------------------------- tiled linear (+ReLU) --------------------------- #

def _linear_kernel(x_ref, w_ref, b_ref, o_ref, acc_ref, *, activation, n_k):
    k = pl.program_id(2)

    @pl.when(k == 0)
    def _():
        acc_ref[...] = jnp.zeros_like(acc_ref)

    acc_ref[...] += jnp.dot(x_ref[...].astype(_MXU_DTYPE),
                            w_ref[...].astype(_MXU_DTYPE),
                            preferred_element_type=jnp.float32)

    @pl.when(k == n_k - 1)
    def _():
        y = acc_ref[...] + b_ref[...].astype(jnp.float32)
        if activation == "relu":
            y = jnp.maximum(y, 0.0)
        o_ref[...] = y.astype(o_ref.dtype)


def linear(x, w, b, activation=None, *, tm=512, tn=512, tk=1024):
    """x: (N, K) f32, w: (K, M) (pre-cast bf16 ok), b: (M,) -> (N, M).
    K-looped MXU matmul (bf16 operands, f32 accumulator), fused bias/ReLU."""
    N, K = x.shape
    K2, M = w.shape
    assert K == K2
    tm = _row_tile(N, tm)
    tn = _pick_divisor_tile(M, tn, 128)
    tk = _pick_divisor_tile(K, tk, 128)
    n_k = K // tk
    kern = functools.partial(_linear_kernel, activation=activation, n_k=n_k)
    return pl.pallas_call(
        kern,
        out_shape=jax.ShapeDtypeStruct((N, M), x.dtype),
        grid_spec=pltpu.PrefetchScalarGridSpec(
            num_scalar_prefetch=0,
            grid=(pl.cdiv(N, tm), M // tn, n_k),
            in_specs=[
                pl.BlockSpec((tm, tk), lambda i, j, k: (i, k)),
                pl.BlockSpec((tk, tn), lambda i, j, k: (k, j)),
                pl.BlockSpec((1, tn), lambda i, j, k: (0, j)),   # bias
            ],
            out_specs=pl.BlockSpec((tm, tn), lambda i, j, k: (i, j)),
            scratch_shapes=[pltpu.VMEM((tm, tn), jnp.float32)],
        ),
        compiler_params=pltpu.CompilerParams(
            dimension_semantics=("parallel", "parallel", "arbitrary"),
            vmem_limit_bytes=_vmem_limit_bytes(),
        ),
    )(x, w, b.reshape(1, M))


# ------- fused matmul + bias + residual + LayerNorm (weight resident) ------- #

def _matmul_resid_ln_kernel(x_ref, w_ref, b_ref, r_ref, g_ref, bt_ref,
                            o_ref, *, eps):
    y = jnp.dot(x_ref[...].astype(_MXU_DTYPE), w_ref[...].astype(_MXU_DTYPE),
                preferred_element_type=jnp.float32)
    y = y + b_ref[...].astype(jnp.float32) + r_ref[...].astype(jnp.float32)
    mean = jnp.mean(y, axis=-1, keepdims=True)
    yc = y - mean
    var = jnp.mean(yc * yc, axis=-1, keepdims=True)
    inv = jax.lax.rsqrt(var + eps)
    o_ref[...] = (yc * inv * g_ref[...].astype(jnp.float32)
                  + bt_ref[...].astype(jnp.float32)).astype(o_ref.dtype)


def matmul_residual_layernorm(x, w, b, resid, gamma, beta, eps=1e-5, *, tm=256):
    """LayerNorm(resid + x @ w + b) * gamma + beta.  The whole (K, M) weight
    stays resident in VMEM (constant index_map); rows are tiled (ragged last
    tile masked), output width = full M for the row-wise LN."""
    N, K = x.shape
    K2, M = w.shape
    assert K == K2 and resid.shape == (N, M)
    tm = _row_tile(N, tm)
    kern = functools.partial(_matmul_resid_ln_kernel, eps=eps)
    return pl.pallas_call(
        kern,
        out_shape=jax.ShapeDtypeStruct((N, M), resid.dtype),
        grid_spec=pltpu.PrefetchScalarGridSpec(
            num_scalar_prefetch=0,
            grid=(pl.cdiv(N, tm),),
            in_specs=[
                pl.BlockSpec((tm, K), lambda i: (i, 0)),
                pl.BlockSpec((K, M), lambda i: (0, 0)),   # weight: resident
                pl.BlockSpec((1, M), lambda i: (0, 0)),   # bias
                pl.BlockSpec((tm, M), lambda i: (i, 0)),  # residual
                pl.BlockSpec((1, M), lambda i: (0, 0)),   # gamma
                pl.BlockSpec((1, M), lambda i: (0, 0)),   # beta
            ],
            out_specs=pl.BlockSpec((tm, M), lambda i: (i, 0)),
        ),
        compiler_params=pltpu.CompilerParams(
            dimension_semantics=("parallel",),
            vmem_limit_bytes=_vmem_limit_bytes(),
        ),
    )(x, w, b.reshape(1, M), resid, gamma.reshape(1, M), beta.reshape(1, M))


# ----------------------- attention (flash KV tiling) ------------------------ #

def _attn_kernel(q_ref, k_ref, v_ref, o_ref, m_ref, l_ref, acc_ref, *,
                 num_heads, head_dim, n_kv):
    # q_ref: (1, tq, E)  query rows (softmax scale pre-folded into q weights)
    # k_ref: (1, tkv, E) key rows     v_ref: (1, tkv, E) value rows
    # scratch: m/l (H, tq, 1) f32, acc (tq, E) f32 (online softmax state)
    ki = pl.program_id(2)

    @pl.when(ki == 0)
    def _():
        m_ref[...] = jnp.full(m_ref.shape, -jnp.inf, dtype=m_ref.dtype)
        l_ref[...] = jnp.zeros_like(l_ref)
        acc_ref[...] = jnp.zeros_like(acc_ref)

    q_rows = q_ref[0].astype(_MXU_DTYPE)        # (tq, E)
    k_rows = k_ref[0].astype(_MXU_DTYPE)        # (tkv, E)
    v_rows = v_ref[0].astype(_MXU_DTYPE)        # (tkv, E)

    for h in range(num_heads):
        lo = h * head_dim
        qh = q_rows[:, lo:lo + head_dim]
        kh = k_rows[:, lo:lo + head_dim]
        vh = v_rows[:, lo:lo + head_dim]
        # scores: contract the head dim directly (no explicit transpose)
        s = jax.lax.dot_general(qh, kh, (((1,), (1,)), ((), ())),
                                preferred_element_type=jnp.float32)  # (tq, tkv)
        m_prev = m_ref[h]                                            # (tq, 1)
        m_new = jnp.maximum(m_prev, jnp.max(s, axis=-1, keepdims=True))
        alpha = jnp.exp(m_prev - m_new)
        p = jnp.exp(s - m_new)
        l_ref[h] = alpha * l_ref[h] + jnp.sum(p, axis=-1, keepdims=True)
        pv = jnp.dot(p.astype(_MXU_DTYPE), vh,
                     preferred_element_type=jnp.float32)             # (tq, D)
        acc_ref[:, lo:lo + head_dim] = alpha * acc_ref[:, lo:lo + head_dim] + pv
        m_ref[h] = m_new

    @pl.when(ki == n_kv - 1)
    def _():
        for h in range(num_heads):
            lo = h * head_dim
            inv_l = pl.reciprocal(l_ref[h], approx=True)             # EUP
            acc_ref[:, lo:lo + head_dim] = acc_ref[:, lo:lo + head_dim] * inv_l
        o_ref[0] = acc_ref[...].astype(o_ref.dtype)   # single lane-dense store


def attention(qkv, num_heads, *, tq=256, tkv=512):
    """qkv: (B, T, 3E), q-part pre-scaled -> (B, T, E) softmax(q k^T) v per head.

    The qkv array is passed three times with E-wide lane-slab BlockSpecs
    (last-dim block indices 0/1/2 select q/k/v), so no unused lanes are DMA'd
    and no head-split transposes ever round-trip HBM.  The KV axis is a grid
    axis with online-softmax scratch, so VMEM use is independent of T.
    """
    B, T, E3 = qkv.shape
    E = E3 // 3
    D = E // num_heads
    assert E % 128 == 0, "embed_dim must be a multiple of 128 (lane-slab blocks)"
    tq = _pick_divisor_tile(T, tq, 8)
    tkv = _pick_divisor_tile(T, tkv, 128)
    n_kv = T // tkv
    kern = functools.partial(_attn_kernel, num_heads=num_heads,
                             head_dim=D, n_kv=n_kv)
    return pl.pallas_call(
        kern,
        out_shape=jax.ShapeDtypeStruct((B, T, E), qkv.dtype),
        grid_spec=pltpu.PrefetchScalarGridSpec(
            num_scalar_prefetch=0,
            grid=(B, T // tq, n_kv),
            in_specs=[
                pl.BlockSpec((1, tq, E), lambda b, qi, ki: (b, qi, 0)),   # q
                pl.BlockSpec((1, tkv, E), lambda b, qi, ki: (b, ki, 1)),  # k
                pl.BlockSpec((1, tkv, E), lambda b, qi, ki: (b, ki, 2)),  # v
            ],
            out_specs=pl.BlockSpec((1, tq, E), lambda b, qi, ki: (b, qi, 0)),
            scratch_shapes=[
                pltpu.VMEM((num_heads, tq, 1), jnp.float32),   # m (running max)
                pltpu.VMEM((num_heads, tq, 1), jnp.float32),   # l (running sum)
                pltpu.VMEM((tq, E), jnp.float32),              # acc
            ],
        ),
        compiler_params=pltpu.CompilerParams(
            dimension_semantics=("parallel", "parallel", "arbitrary"),
            vmem_limit_bytes=_vmem_limit_bytes(),
        ),
    )(qkv, qkv, qkv)


# --------------------------- parameter preprocessing ------------------------ #

def prepare_params(params, num_heads):
    """One-time preprocessing (hoisted out of the forward): fuse q/k/v weights,
    fold the softmax scale into the q projection, pre-cast matmul weights to
    the MXU operand dtype (bf16).  Biases / LN params stay f32."""
    E = params["q_w"].shape[0]
    D = E // num_heads
    scaling = float(D) ** -0.5
    qkv_w = jnp.concatenate(
        [params["q_w"] * scaling, params["k_w"], params["v_w"]], axis=1)
    qkv_b = jnp.concatenate(
        [params["q_b"] * scaling, params["k_b"], params["v_b"]])
    cast = lambda w: w.astype(_MXU_DTYPE)
    return {
        "qkv_w": cast(qkv_w), "qkv_b": qkv_b,
        "out_w": cast(params["out_w"]), "out_b": params["out_b"],
        "fc1_w": cast(params["fc1_w"]), "fc1_b": params["fc1_b"],
        "fc2_w": cast(params["fc2_w"]), "fc2_b": params["fc2_b"],
        "ln1_g": params["ln1_g"], "ln1_b": params["ln1_b"],
        "ln2_g": params["ln2_g"], "ln2_b": params["ln2_b"],
    }


# ------------------------------ Layer forward ------------------------------- #

def transformer_sentence_encoder_layer(x, prepared, num_heads):
    """Post-LN transformer encoder layer (layer_norm_first=False), ReLU FFN.

    x: (T, B, E) time-major, as in fairseq.  Returns (out, None).
    """
    T, B, E = x.shape

    # TODO(synk): for a stacked encoder keep activations batch-major across all
    # layers and hoist these two transposes to model entry/exit.
    xf = x.transpose(1, 0, 2).reshape(B * T, E)

    # --- self-attention block ---
    qkv = linear(xf, prepared["qkv_w"], prepared["qkv_b"])        # (B*T, 3E)
    attn = attention(qkv.reshape(B, T, 3 * E), num_heads)         # (B, T, E)
    attn = attn.reshape(B * T, E)

    # out_proj + dropout1(identity) + residual + self_attn_layer_norm, fused.
    x1 = matmul_residual_layernorm(attn, prepared["out_w"], prepared["out_b"],
                                   xf, prepared["ln1_g"], prepared["ln1_b"])

    # --- FFN block ---
    h = linear(x1, prepared["fc1_w"], prepared["fc1_b"], activation="relu")
    # fc2 + dropout2/3(identity) + residual + final_layer_norm, fused.
    x2 = matmul_residual_layernorm(h, prepared["fc2_w"], prepared["fc2_b"],
                                   x1, prepared["ln2_g"], prepared["ln2_b"])

    out = x2.reshape(B, T, E).transpose(1, 0, 2)                  # (T, B, E)

    # need_weights=False -> attn weights not returned.
    # TODO(synk): key_padding_mask / attn_mask and training-mode dropout are
    # not implemented (inference semantics, no masking).
    return out, None


# --------------------------- pure-JAX reference ----------------------------- #

def _ref_layer(x, params, num_heads):
    hp = jax.lax.Precision.HIGHEST
    T, B, E = x.shape
    H = num_heads
    D = E // H
    scaling = float(D) ** -0.5
    xf = x.reshape(T * B, E)

    def lin(t, w, b):
        return jnp.dot(t, w, precision=hp) + b

    q = lin(xf, params["q_w"], params["q_b"]) * scaling
    k = lin(xf, params["k_w"], params["k_b"])
    v = lin(xf, params["v_w"], params["v_b"])
    sh = lambda t: t.reshape(T, B * H, D).transpose(1, 0, 2)
    qh, kh, vh = sh(q), sh(k), sh(v)
    s = jnp.einsum("btd,bsd->bts", qh, kh, precision=hp)
    p = jax.nn.softmax(s, axis=-1)
    a = jnp.einsum("bts,bsd->btd", p, vh, precision=hp)
    a = a.transpose(1, 0, 2).reshape(T * B, E)
    a = lin(a, params["out_w"], params["out_b"])

    def ln(t, g, b):
        mean = jnp.mean(t, axis=-1, keepdims=True)
        var = jnp.mean((t - mean) ** 2, axis=-1, keepdims=True)
        return (t - mean) * jax.lax.rsqrt(var + 1e-5) * g + b

    x1 = ln(xf + a, params["ln1_g"], params["ln1_b"])
    h = jnp.maximum(lin(x1, params["fc1_w"], params["fc1_b"]), 0.0)
    h = lin(h, params["fc2_w"], params["fc2_b"])
    x2 = ln(x1 + h, params["ln2_g"], params["ln2_b"])
    return x2.reshape(T, B, E)


# ---------------------------------- main ------------------------------------ #

if __name__ == "__main__":
    # seq, batch, embed (multiple of 128 for lane-slab attention), heads, ffn
    T, B, E, H, F = 16, 2, 128, 4, 256

    key = jax.random.PRNGKey(0)
    keys = jax.random.split(key, 14)

    def init(k, shape, scale=0.05):
        return scale * jax.random.normal(k, shape, dtype=jnp.float32)

    params = {
        "q_w": init(keys[0], (E, E)),  "q_b": init(keys[1], (E,)),
        "k_w": init(keys[2], (E, E)),  "k_b": init(keys[3], (E,)),
        "v_w": init(keys[4], (E, E)),  "v_b": init(keys[5], (E,)),
        "out_w": init(keys[6], (E, E)), "out_b": init(keys[7], (E,)),
        "fc1_w": init(keys[8], (E, F)), "fc1_b": init(keys[9], (F,)),
        "fc2_w": init(keys[10], (F, E)), "fc2_b": init(keys[11], (E,)),
        "ln1_g": jnp.ones((E,), jnp.float32), "ln1_b": jnp.zeros((E,), jnp.float32),
        "ln2_g": jnp.ones((E,), jnp.float32), "ln2_b": jnp.zeros((E,), jnp.float32),
    }

    x = jax.random.normal(keys[12], (T, B, E), dtype=jnp.float32)

    prepared = prepare_params(params, H)          # one-time, outside the forward
    fwd = jax.jit(transformer_sentence_encoder_layer, static_argnums=(2,))
    out, attn_w = fwd(x, prepared, H)
    out = jax.block_until_ready(out)

    ref = jax.block_until_ready(_ref_layer(x, params, H))
    assert out.shape == (T, B, E) and out.dtype == jnp.float32
    assert attn_w is None
    # tolerance 3e-2: bf16 MXU operands (f32 accumulation) + EUP approx
    # reciprocal in the softmax normalization, vs. an f32 HIGHEST reference.
    assert jnp.allclose(out, ref, atol=3e-2, rtol=3e-2), "mismatch vs reference"

    print("KERNEL_OK")
</pallas_src>

<mosaic_0001>
module attributes {stable_mosaic.version = 11 : i64} {
  func.func @_linear_kernel(%arg0: i32, %arg1: i32, %arg2: i32, %arg3: memref<32x128xf32, #tpu.memory_space<vmem>>, %arg4: memref<128x384xbf16, #tpu.memory_space<vmem>>, %arg5: memref<1x384xf32, #tpu.memory_space<vmem>>, %arg6: memref<32x384xf32, #tpu.memory_space<vmem>>, %arg7: memref<32x384xf32, #tpu.memory_space<vmem>>) attributes {dimension_semantics = [#tpu.dimension_semantics<parallel>, #tpu.dimension_semantics<parallel>, #tpu.dimension_semantics<arbitrary>], iteration_bounds = array<i64: 1, 1, 1>, scalar_prefetch = 0 : i64, scratch_operands = 1 : i64, tpu.core_type = #tpu.core_type<tc>, window_params = [{transform_indices = @transform_0, window_bounds = array<i64: 32, 128>}, {transform_indices = @transform_1, window_bounds = array<i64: 128, 384>}, {transform_indices = @transform_2, window_bounds = array<i64: 1, 384>}, {transform_indices = @transform_3, window_bounds = array<i64: 32, 384>}]} {
    %c0_i32 = arith.constant 0 : i32
    %0 = arith.cmpi eq, %arg2, %c0_i32 : i32
    %1 = arith.extui %0 : i1 to i32
    %c0_i32_0 = arith.constant 0 : i32
    %2 = arith.cmpi ne, %1, %c0_i32_0 : i32
    scf.if %2 {
      %cst_10 = arith.constant 0.000000e+00 : f32
      %13 = vector.broadcast %cst_10 : f32 to vector<32x384xf32>
      %c0_11 = arith.constant 0 : index
      %c0_12 = arith.constant 0 : index
      %14 = vector.load %arg7[%c0_11, %c0_12] : memref<32x384xf32, #tpu.memory_space<vmem>>, vector<32x384xf32>
      tpu.vector_store %arg7[%c0_11, %c0_12], %13 {strides = array<i32>} : memref<32x384xf32, #tpu.memory_space<vmem>>, vector<32x384xf32>,
    } else {
    }
    %c0 = arith.constant 0 : index
    %c0_1 = arith.constant 0 : index
    %3 = vector.load %arg7[%c0, %c0_1] : memref<32x384xf32, #tpu.memory_space<vmem>>, vector<32x384xf32>
    %c0_2 = arith.constant 0 : index
    %c0_3 = arith.constant 0 : index
    %4 = vector.load %arg3[%c0_2, %c0_3] : memref<32x128xf32, #tpu.memory_space<vmem>>, vector<32x128xf32>
    %5 = arith.truncf %4 : vector<32x128xf32> to vector<32x128xbf16>
    %c0_4 = arith.constant 0 : index
    %c0_5 = arith.constant 0 : index
    %6 = vector.load %arg4[%c0_4, %c0_5] : memref<128x384xbf16, #tpu.memory_space<vmem>>, vector<128x384xbf16>
    %cst = arith.constant dense<0.000000e+00> : vector<32x384xf32>
    %7 = tpu.matmul %5, %6, %cst {dimension_numbers = #tpu.dot_dimension_numbers<[1], [0], [0], [1], [0, 0, 1, 1], [], []>} : vector<32x128xbf16>, vector<128x384xbf16>, vector<32x384xf32> -> vector<32x384xf32>
    %8 = arith.addf %3, %7 : vector<32x384xf32>
    %c0_6 = arith.constant 0 : index
    %c0_7 = arith.constant 0 : index
    %9 = vector.load %arg7[%c0_6, %c0_7] : memref<32x384xf32, #tpu.memory_space<vmem>>, vector<32x384xf32>
    tpu.vector_store %arg7[%c0_6, %c0_7], %8 {strides = array<i32>} : memref<32x384xf32, #tpu.memory_space<vmem>>, vector<32x384xf32>,
    %c0_i32_8 = arith.constant 0 : i32
    %10 = arith.cmpi eq, %arg2, %c0_i32_8 : i32
    %11 = arith.extui %10 : i1 to i32
    %c0_i32_9 = arith.constant 0 : i32
    %12 = arith.cmpi ne, %11, %c0_i32_9 : i32
    scf.if %12 {
      %c0_10 = arith.constant 0 : index
      %c0_11 = arith.constant 0 : index
      %13 = vector.load %arg7[%c0_10, %c0_11] : memref<32x384xf32, #tpu.memory_space<vmem>>, vector<32x384xf32>
      %c0_12 = arith.constant 0 : index
      %c0_13 = arith.constant 0 : index
      %14 = vector.load %arg5[%c0_12, %c0_13] : memref<1x384xf32, #tpu.memory_space<vmem>>, vector<1x384xf32>
      %15 = vector.broadcast %14 : vector<1x384xf32> to vector<32x384xf32>
      %16 = arith.addf %13, %15 : vector<32x384xf32>
      %c0_14 = arith.constant 0 : index
      %c0_15 = arith.constant 0 : index
      %17 = vector.load %arg6[%c0_14, %c0_15] : memref<32x384xf32, #tpu.memory_space<vmem>>, vector<32x384xf32>
      tpu.vector_store %arg6[%c0_14, %c0_15], %16 {strides = array<i32>} : memref<32x384xf32, #tpu.memory_space<vmem>>, vector<32x384xf32>,
    } else {
    }
    return
  }
  func.func @transform_0(%arg0: i32, %arg1: i32, %arg2: i32) -> (i32, i32) {
    %c0_i32 = arith.constant 0 : i32
    return %arg0, %arg2 : i32, i32
  }
  func.func @transform_1(%arg0: i32, %arg1: i32, %arg2: i32) -> (i32, i32) {
    %c0_i32 = arith.constant 0 : i32
    return %arg2, %arg1 : i32, i32
  }
  func.func @transform_2(%arg0: i32, %arg1: i32, %arg2: i32) -> (i32, i32) {
    %c0_i32 = arith.constant 0 : i32
    %c0_i32_0 = arith.constant 0 : i32
    return %c0_i32, %arg1 : i32, i32
  }
  func.func @transform_3(%arg0: i32, %arg1: i32, %arg2: i32) -> (i32, i32) {
    %c0_i32 = arith.constant 0 : i32
    return %arg0, %arg1 : i32, i32
  }
}

module attributes {stable_mosaic.version = 11 : i64} {
  func.func @_attn_kernel(%arg0: i32, %arg1: i32, %arg2: i32, %arg3: memref<1x16x128xf32, #tpu.memory_space<vmem>>, %arg4: memref<1x16x128xf32, #tpu.memory_space<vmem>>, %arg5: memref<1x16x128xf32, #tpu.memory_space<vmem>>, %arg6: memref<1x16x128xf32, #tpu.memory_space<vmem>>, %arg7: memref<4x16x1xf32, #tpu.memory_space<vmem>>, %arg8: memref<4x16x1xf32, #tpu.memory_space<vmem>>, %arg9: memref<16x128xf32, #tpu.memory_space<vmem>>) attributes {dimension_semantics = [#tpu.dimension_semantics<parallel>, #tpu.dimension_semantics<parallel>, #tpu.dimension_semantics<arbitrary>], iteration_bounds = array<i64: 2, 1, 1>, scalar_prefetch = 0 : i64, scratch_operands = 3 : i64, tpu.core_type = #tpu.core_type<tc>, window_params = [{transform_indices = @transform_0, window_bounds = array<i64: 1, 16, 128>}, {transform_indices = @transform_1, window_bounds = array<i64: 1, 16, 128>}, {transform_indices = @transform_2, window_bounds = array<i64: 1, 16, 128>}, {transform_indices = @transform_3, window_bounds = array<i64: 1, 16, 128>}]} {
    %c0_i32 = arith.constant 0 : i32
    %0 = arith.cmpi eq, %arg2, %c0_i32 : i32
    %1 = arith.extui %0 : i1 to i32
    %c0_i32_0 = arith.constant 0 : i32
    %2 = arith.cmpi ne, %1, %c0_i32_0 : i32
    scf.if %2 {
      %cst_84 = arith.constant 0xFF800000 : f32
      %147 = vector.broadcast %cst_84 : f32 to vector<4x16x1xf32>
      %c0_85 = arith.constant 0 : index
      %c0_86 = arith.constant 0 : index
      %c0_87 = arith.constant 0 : index
      %148 = vector.load %arg7[%c0_85, %c0_86, %c0_87] : memref<4x16x1xf32, #tpu.memory_space<vmem>>, vector<4x16x1xf32>
      tpu.vector_store %arg7[%c0_85, %c0_86, %c0_87], %147 {strides = array<i32>} : memref<4x16x1xf32, #tpu.memory_space<vmem>>, vector<4x16x1xf32>,
      %cst_88 = arith.constant 0.000000e+00 : f32
      %149 = vector.broadcast %cst_88 : f32 to vector<4x16x1xf32>
      %c0_89 = arith.constant 0 : index
      %c0_90 = arith.constant 0 : index
      %c0_91 = arith.constant 0 : index
      %150 = vector.load %arg8[%c0_89, %c0_90, %c0_91] : memref<4x16x1xf32, #tpu.memory_space<vmem>>, vector<4x16x1xf32>
      tpu.vector_store %arg8[%c0_89, %c0_90, %c0_91], %149 {strides = array<i32>} : memref<4x16x1xf32, #tpu.memory_space<vmem>>, vector<4x16x1xf32>,
      %cst_92 = arith.constant 0.000000e+00 : f32
      %151 = vector.broadcast %cst_92 : f32 to vector<16x128xf32>
      %c0_93 = arith.constant 0 : index
      %c0_94 = arith.constant 0 : index
      %152 = vector.load %arg9[%c0_93, %c0_94] : memref<16x128xf32, #tpu.memory_space<vmem>>, vector<16x128xf32>
      tpu.vector_store %arg9[%c0_93, %c0_94], %151 {strides = array<i32>} : memref<16x128xf32, #tpu.memory_space<vmem>>, vector<16x128xf32>,
    } else {
    }
    %c0 = arith.constant 0 : index
    %c0_1 = arith.constant 0 : index
    %c0_2 = arith.constant 0 : index
    %3 = vector.load %arg3[%c0, %c0_1, %c0_2] : memref<1x16x128xf32, #tpu.memory_space<vmem>>, vector<1x16x128xf32>
    %4 = vector.shape_cast %3 : vector<1x16x128xf32> to vector<16x128xf32>
    %5 = arith.truncf %4 : vector<16x128xf32> to vector<16x128xbf16>
    %c0_3 = arith.constant 0 : index
    %c0_4 = arith.constant 0 : index
    %c0_5 = arith.constant 0 : index
    %6 = vector.load %arg4[%c0_3, %c0_4, %c0_5] : memref<1x16x128xf32, #tpu.memory_space<vmem>>, vector<1x16x128xf32>
    %7 = vector.shape_cast %6 : vector<1x16x128xf32> to vector<16x128xf32>
    %8 = arith.truncf %7 : vector<16x128xf32> to vector<16x128xbf16>
    %c0_6 = arith.constant 0 : index
    %c0_7 = arith.constant 0 : index
    %c0_8 = arith.constant 0 : index
    %9 = vector.load %arg5[%c0_6, %c0_7, %c0_8] : memref<1x16x128xf32, #tpu.memory_space<vmem>>, vector<1x16x128xf32>
    %10 = vector.shape_cast %9 : vector<1x16x128xf32> to vector<16x128xf32>
    %11 = arith.truncf %10 : vector<16x128xf32> to vector<16x128xbf16>
    %12 = vector.extract_strided_slice %5 {offsets = [0, 0], sizes = [16, 32], strides = [1, 1]} : vector<16x128xbf16> to vector<16x32xbf16>
    %13 = vector.extract_strided_slice %8 {offsets = [0, 0], sizes = [16, 32], strides = [1, 1]} : vector<16x128xbf16> to vector<16x32xbf16>
    %14 = vector.extract_strided_slice %11 {offsets = [0, 0], sizes = [16, 32], strides = [1, 1]} : vector<16x128xbf16> to vector<16x32xbf16>
    %cst = arith.constant dense<0.000000e+00> : vector<16x16xf32>
    %15 = tpu.matmul %12, %13, %cst {dimension_numbers = #tpu.dot_dimension_numbers<[1], [1], [0], [0], [0, 0, 1, 0], [], []>} : vector<16x32xbf16>, vector<16x32xbf16>, vector<16x16xf32> -> vector<16x16xf32>
    %c0_9 = arith.constant 0 : index
    %c0_10 = arith.constant 0 : index
    %c0_11 = arith.constant 0 : index
    %16 = vector.load %arg7[%c0_9, %c0_10, %c0_11] : memref<4x16x1xf32, #tpu.memory_space<vmem>>, vector<1x16x1xf32>
    %17 = vector.shape_cast %16 : vector<1x16x1xf32> to vector<16x1xf32>
    %cst_12 = arith.constant dense<0xFF800000> : vector<16xf32>
    %18 = vector.multi_reduction <maximumf>, %15, %cst_12 [1] : vector<16x16xf32> to vector<16xf32>
    %19 = vector.shape_cast %18 : vector<16xf32> to vector<16x1xf32>
    %20 = arith.maximumf %17, %19 : vector<16x1xf32>
    %21 = arith.subf %17, %20 : vector<16x1xf32>
    %22 = math.exp %21 : vector<16x1xf32>
    %23 = vector.broadcast %20 : vector<16x1xf32> to vector<16x16xf32>
    %24 = arith.subf %15, %23 : vector<16x16xf32>
    %25 = math.exp %24 : vector<16x16xf32>
    %c0_13 = arith.constant 0 : index
    %c0_14 = arith.constant 0 : index
    %c0_15 = arith.constant 0 : index
    %26 = vector.load %arg8[%c0_13, %c0_14, %c0_15] : memref<4x16x1xf32, #tpu.memory_space<vmem>>, vector<1x16x1xf32>
    %27 = vector.shape_cast %26 : vector<1x16x1xf32> to vector<16x1xf32>
    %28 = arith.mulf %22, %27 : vector<16x1xf32>
    %cst_16 = arith.constant dense<0.000000e+00> : vector<16xf32>
    %29 = vector.multi_reduction <add>, %25, %cst_16 [1] : vector<16x16xf32> to vector<16xf32>
    %30 = vector.shape_cast %29 : vector<16xf32> to vector<16x1xf32>
    %31 = arith.addf %28, %30 : vector<16x1xf32>
    %c0_17 = arith.constant 0 : index
    %c0_18 = arith.constant 0 : index
    %c0_19 = arith.constant 0 : index
    %32 = vector.load %arg8[%c0_17, %c0_18, %c0_19] : memref<4x16x1xf32, #tpu.memory_space<vmem>>, vector<1x16x1xf32>
    %33 = vector.shape_cast %32 : vector<1x16x1xf32> to vector<16x1xf32>
    %34 = vector.shape_cast %31 : vector<16x1xf32> to vector<1x16x1xf32>
    tpu.vector_store %arg8[%c0_17, %c0_18, %c0_19], %34 {strides = array<i32>} : memref<4x16x1xf32, #tpu.memory_space<vmem>>, vector<1x16x1xf32>,
    %35 = arith.truncf %25 : vector<16x16xf32> to vector<16x16xbf16>
    %cst_20 = arith.constant dense<0.000000e+00> : vector<16x32xf32>
    %36 = tpu.matmul %35, %14, %cst_20 {dimension_numbers = #tpu.dot_dimension_numbers<[1], [0], [0], [1], [0, 0, 1, 1], [], []>} : vector<16x16xbf16>, vector<16x32xbf16>, vector<16x32xf32> -> vector<16x32xf32>
    %c0_21 = arith.constant 0 : index
    %c0_22 = arith.constant 0 : index
    %37 = vector.load %arg9[%c0_21, %c0_22] : memref<16x128xf32, #tpu.memory_space<vmem>>, vector<16x32xf32>
    %38 = vector.broadcast %22 : vector<16x1xf32> to vector<16x32xf32>
    %39 = arith.mulf %38, %37 : vector<16x32xf32>
    %40 = arith.addf %39, %36 : vector<16x32xf32>
    %c0_23 = arith.constant 0 : index
    %c0_24 = arith.constant 0 : index
    %41 = vector.load %arg9[%c0_23, %c0_24] : memref<16x128xf32, #tpu.memory_space<vmem>>, vector<16x32xf32>
    tpu.vector_store %arg9[%c0_23, %c0_24], %40 {strides = array<i32>} : memref<16x128xf32, #tpu.memory_space<vmem>>, vector<16x32xf32>,
    %c0_25 = arith.constant 0 : index
    %c0_26 = arith.constant 0 : index
    %c0_27 = arith.constant 0 : index
    %42 = vector.load %arg7[%c0_25, %c0_26, %c0_27] : memref<4x16x1xf32, #tpu.memory_space<vmem>>, vector<1x16x1xf32>
    %43 = vector.shape_cast %42 : vector<1x16x1xf32> to vector<16x1xf32>
    %44 = vector.shape_cast %20 : vector<16x1xf32> to vector<1x16x1xf32>
    tpu.vector_store %arg7[%c0_25, %c0_26, %c0_27], %44 {strides = array<i32>} : memref<4x16x1xf32, #tpu.memory_space<vmem>>, vector<1x16x1xf32>,
    %45 = vector.extract_strided_slice %5 {offsets = [0, 32], sizes = [16, 32], strides = [1, 1]} : vector<16x128xbf16> to vector<16x32xbf16>
    %46 = vector.extract_strided_slice %8 {offsets = [0, 32], sizes = [16, 32], strides = [1, 1]} : vector<16x128xbf16> to vector<16x32xbf16>
    %47 = vector.extract_strided_slice %11 {offsets = [0, 32], sizes = [16, 32], strides = [1, 1]} : vector<16x128xbf16> to vector<16x32xbf16>
    %cst_28 = arith.constant dense<0.000000e+00> : vector<16x16xf32>
    %48 = tpu.matmul %45, %46, %cst_28 {dimension_numbers = #tpu.dot_dimension_numbers<[1], [1], [0], [0], [0, 0, 1, 0], [], []>} : vector<16x32xbf16>, vector<16x32xbf16>, vector<16x16xf32> -> vector<16x16xf32>
    %c1 = arith.constant 1 : index
    %c0_29 = arith.constant 0 : index
    %c0_30 = arith.constant 0 : index
    %49 = vector.load %arg7[%c1, %c0_29, %c0_30] : memref<4x16x1xf32, #tpu.memory_space<vmem>>, vector<1x16x1xf32>
    %50 = vector.shape_cast %49 : vector<1x16x1xf32> to vector<16x1xf32>
    %cst_31 = arith.constant dense<0xFF800000> : vector<16xf32>
    %51 = vector.multi_reduction <maximumf>, %48, %cst_31 [1] : vector<16x16xf32> to vector<16xf32>
    %52 = vector.shape_cast %51 : vector<16xf32> to vector<16x1xf32>
    %53 = arith.maximumf %50, %52 : vector<16x1xf32>
    %54 = arith.subf %50, %53 : vector<16x1xf32>
    %55 = math.exp %54 : vector<16x1xf32>
    %56 = vector.broadcast %53 : vector<16x1xf32> to vector<16x16xf32>
    %57 = arith.subf %48, %56 : vector<16x16xf32>
    %58 = math.exp %57 : vector<16x16xf32>
    %c1_32 = arith.constant 1 : index
    %c0_33 = arith.constant 0 : index
    %c0_34 = arith.constant 0 : index
    %59 = vector.load %arg8[%c1_32, %c0_33, %c0_34] : memref<4x16x1xf32, #tpu.memory_space<vmem>>, vector<1x16x1xf32>
    %60 = vector.shape_cast %59 : vector<1x16x1xf32> to vector<16x1xf32>
    %61 = arith.mulf %55, %60 : vector<16x1xf32>
    %cst_35 = arith.constant dense<0.000000e+00> : vector<16xf32>
    %62 = vector.multi_reduction <add>, %58, %cst_35 [1] : vector<16x16xf32> to vector<16xf32>
    %63 = vector.shape_cast %62 : vector<16xf32> to vector<16x1xf32>
    %64 = arith.addf %61, %63 : vector<16x1xf32>
    %c1_36 = arith.constant 1 : index
    %c0_37 = arith.constant 0 : index
    %c0_38 = arith.constant 0 : index
    %65 = vector.load %arg8[%c1_36, %c0_37, %c0_38] : memref<4x16x1xf32, #tpu.memory_space<vmem>>, vector<1x16x1xf32>
    %66 = vector.shape_cast %65 : vector<1x16x1xf32> to vector<16x1xf32>
    %67 = vector.shape_cast %64 : vector<16x1xf32> to vector<1x16x1xf32>
    tpu.vector_store %arg8[%c1_36, %c0_37, %c0_38], %67 {strides = array<i32>} : memref<4x16x1xf32, #tpu.memory_space<vmem>>, vector<1x16x1xf32>,
    %68 = arith.truncf %58 : vector<16x16xf32> to vector<16x16xbf16>
    %cst_39 = arith.constant dense<0.000000e+00> : vector<16x32xf32>
    %69 = tpu.matmul %68, %47, %cst_39 {dimension_numbers = #tpu.dot_dimension_numbers<[1], [0], [0], [1], [0, 0, 1, 1], [], []>} : vector<16x16xbf16>, vector<16x32xbf16>, vector<16x32xf32> -> vector<16x32xf32>
    %c0_40 = arith.constant 0 : index
    %c32 = arith.constant 32 : index
    %70 = vector.load %arg9[%c0_40, %c32] : memref<16x128xf32, #tpu.memory_space<vmem>>, vector<16x32xf32>
    %71 = vector.broadcast %55 : vector<16x1xf32> to vector<16x32xf32>
    %72 = arith.mulf %71, %70 : vector<16x32xf32>
    %73 = arith.addf %72, %69 : vector<16x32xf32>
    %c0_41 = arith.constant 0 : index
    %c32_42 = arith.constant 32 : index
    %74 = vector.load %arg9[%c0_41, %c32_42] : memref<16x128xf32, #tpu.memory_space<vmem>>, vector<16x32xf32>
    tpu.vector_store %arg9[%c0_41, %c32_42], %73 {strides = array<i32>} : memref<16x128xf32, #tpu.memory_space<vmem>>, vector<16x32xf32>,
    %c1_43 = arith.constant 1 : index
    %c0_44 = arith.constant 0 : index
    %c0_45 = arith.constant 0 : index
    %75 = vector.load %arg7[%c1_43, %c0_44, %c0_45] : memref<4x16x1xf32, #tpu.memory_space<vmem>>, vector<1x16x1xf32>
    %76 = vector.shape_cast %75 : vector<1x16x1xf32> to vector<16x1xf32>
    %77 = vector.shape_cast %53 : vector<16x1xf32> to vector<1x16x1xf32>
    tpu.vector_store %arg7[%c1_43, %c0_44, %c0_45], %77 {strides = array<i32>} : memref<4x16x1xf32, #tpu.memory_space<vmem>>, vector<1x16x1xf32>,
    %78 = vector.extract_strided_slice %5 {offsets = [0, 64], sizes = [16, 32], strides = [1, 1]} : vector<16x128xbf16> to vector<16x32xbf16>
    %79 = vector.extract_strided_slice %8 {offsets = [0, 64], sizes = [16, 32], strides = [1, 1]} : vector<16x128xbf16> to vector<16x32xbf16>
    %80 = vector.extract_strided_slice %11 {offsets = [0, 64], sizes = [16, 32], strides = [1, 1]} : vector<16x128xbf16> to vector<16x32xbf16>
    %cst_46 = arith.constant dense<0.000000e+00> : vector<16x16xf32>
    %81 = tpu.matmul %78, %79, %cst_46 {dimension_numbers = #tpu.dot_dimension_numbers<[1], [1], [0], [0], [0, 0, 1, 0], [], []>} : vector<16x32xbf16>, vector<16x32xbf16>, vector<16x16xf32> -> vector<16x16xf32>
    %c2 = arith.constant 2 : index
    %c0_47 = arith.constant 0 : index
    %c0_48 = arith.constant 0 : index
    %82 = vector.load %arg7[%c2, %c0_47, %c0_48] : memref<4x16x1xf32, #tpu.memory_space<vmem>>, vector<1x16x1xf32>
    %83 = vector.shape_cast %82 : vector<1x16x1xf32> to vector<16x1xf32>
    %cst_49 = arith.constant dense<0xFF800000> : vector<16xf32>
    %84 = vector.multi_reduction <maximumf>, %81, %cst_49 [1] : vector<16x16xf32> to vector<16xf32>
    %85 = vector.shape_cast %84 : vector<16xf32> to vector<16x1xf32>
    %86 = arith.maximumf %83, %85 : vector<16x1xf32>
    %87 = arith.subf %83, %86 : vector<16x1xf32>
    %88 = math.exp %87 : vector<16x1xf32>
    %89 = vector.broadcast %86 : vector<16x1xf32> to vector<16x16xf32>
    %90 = arith.subf %81, %89 : vector<16x16xf32>
    %91 = math.exp %90 : vector<16x16xf32>
    %c2_50 = arith.constant 2 : index
    %c0_51 = arith.constant 0 : index
    %c0_52 = arith.constant 0 : index
    %92 = vector.load %arg8[%c2_50, %c0_51, %c0_52] : memref<4x16x1xf32, #tpu.memory_space<vmem>>, vector<1x16x1xf32>
    %93 = vector.shape_cast %92 : vector<1x16x1xf32> to vector<16x1xf32>
    %94 = arith.mulf %88, %93 : vector<16x1xf32>
    %cst_53 = arith.constant dense<0.000000e+00> : vector<16xf32>
    %95 = vector.multi_reduction <add>, %91, %cst_53 [1] : vector<16x16xf32> to vector<16xf32>
    %96 = vector.shape_cast %95 : vector<16xf32> to vector<16x1xf32>
    %97 = arith.addf %94, %96 : vector<16x1xf32>
    %c2_54 = arith.constant 2 : index
    %c0_55 = arith.constant 0 : index
    %c0_56 = arith.constant 0 : index
    %98 = vector.load %arg8[%c2_54, %c0_55, %c0_56] : memref<4x16x1xf32, #tpu.memory_space<vmem>>, vector<1x16x1xf32>
    %99 = vector.shape_cast %98 : vector<1x16x1xf32> to vector<16x1xf32>
    %100 = vector.shape_cast %97 : vector<16x1xf32> to vector<1x16x1xf32>
    tpu.vector_store %arg8[%c2_54, %c0_55, %c0_56], %100 {strides = array<i32>} : memref<4x16x1xf32, #tpu.memory_space<vmem>>, vector<1x16x1xf32>,
    %101 = arith.truncf %91 : vector<16x16xf32> to vector<16x16xbf16>
    %cst_57 = arith.constant dense<0.000000e+00> : vector<16x32xf32>
    %102 = tpu.matmul %101, %80, %cst_57 {dimension_numbers = #tpu.dot_dimension_numbers<[1], [0], [0], [1], [0, 0, 1, 1], [], []>} : vector<16x16xbf16>, vector<16x32xbf16>, vector<16x32xf32> -> vector<16x32xf32>
    %c0_58 = arith.constant 0 : index
    %c64 = arith.constant 64 : index
    %103 = vector.load %arg9[%c0_58, %c64] : memref<16x128xf32, #tpu.memory_space<vmem>>, vector<16x32xf32>
    %104 = vector.broadcast %88 : vector<16x1xf32> to vector<16x32xf32>
    %105 = arith.mulf %104, %103 : vector<16x32xf32>
    %106 = arith.addf %105, %102 : vector<16x32xf32>
    %c0_59 = arith.constant 0 : index
    %c64_60 = arith.constant 64 : index
    %107 = vector.load %arg9[%c0_59, %c64_60] : memref<16x128xf32, #tpu.memory_space<vmem>>, vector<16x32xf32>
    tpu.vector_store %arg9[%c0_59, %c64_60], %106 {strides = array<i32>} : memref<16x128xf32, #tpu.memory_space<vmem>>, vector<16x32xf32>,
    %c2_61 = arith.constant 2 : index
    %c0_62 = arith.constant 0 : index
    %c0_63 = arith.constant 0 : index
    %108 = vector.load %arg7[%c2_61, %c0_62, %c0_63] : memref<4x16x1xf32, #tpu.memory_space<vmem>>, vector<1x16x1xf32>
    %109 = vector.shape_cast %108 : vector<1x16x1xf32> to vector<16x1xf32>
    %110 = vector.shape_cast %86 : vector<16x1xf32> to vector<1x16x1xf32>
    tpu.vector_store %arg7[%c2_61, %c0_62, %c0_63], %110 {strides = array<i32>} : memref<4x16x1xf32, #tpu.memory_space<vmem>>, vector<1x16x1xf32>,
    %111 = vector.extract_strided_slice %5 {offsets = [0, 96], sizes = [16, 32], strides = [1, 1]} : vector<16x128xbf16> to vector<16x32xbf16>
    %112 = vector.extract_strided_slice %8 {offsets = [0, 96], sizes = [16, 32], strides = [1, 1]} : vector<16x128xbf16> to vector<16x32xbf16>
    %113 = vector.extract_strided_slice %11 {offsets = [0, 96], sizes = [16, 32], strides = [1, 1]} : vector<16x128xbf16> to vector<16x32xbf16>
    %cst_64 = arith.constant dense<0.000000e+00> : vector<16x16xf32>
    %114 = tpu.matmul %111, %112, %cst_64 {dimension_numbers = #tpu.dot_dimension_numbers<[1], [1], [0], [0], [0, 0, 1, 0], [], []>} : vector<16x32xbf16>, vector<16x32xbf16>, vector<16x16xf32> -> vector<16x16xf32>
    %c3 = arith.constant 3 : index
    %c0_65 = arith.constant 0 : index
    %c0_66 = arith.constant 0 : index
    %115 = vector.load %arg7[%c3, %c0_65, %c0_66] : memref<4x16x1xf32, #tpu.memory_space<vmem>>, vector<1x16x1xf32>
    %116 = vector.shape_cast %115 : vector<1x16x1xf32> to vector<16x1xf32>
    %cst_67 = arith.constant dense<0xFF800000> : vector<16xf32>
    %117 = vector.multi_reduction <maximumf>, %114, %cst_67 [1] : vector<16x16xf32> to vector<16xf32>
    %118 = vector.shape_cast %117 : vector<16xf32> to vector<16x1xf32>
    %119 = arith.maximumf %116, %118 : vector<16x1xf32>
    %120 = arith.subf %116, %119 : vector<16x1xf32>
    %121 = math.exp %120 : vector<16x1xf32>
    %122 = vector.broadcast %119 : vector<16x1xf32> to vector<16x16xf32>
    %123 = arith.subf %114, %122 : vector<16x16xf32>
    %124 = math.exp %123 : vector<16x16xf32>
    %c3_68 = arith.constant 3 : index
    %c0_69 = arith.constant 0 : index
    %c0_70 = arith.constant 0 : index
    %125 = vector.load %arg8[%c3_68, %c0_69, %c0_70] : memref<4x16x1xf32, #tpu.memory_space<vmem>>, vector<1x16x1xf32>
    %126 = vector.shape_cast %125 : vector<1x16x1xf32> to vector<16x1xf32>
    %127 = arith.mulf %121, %126 : vector<16x1xf32>
    %cst_71 = arith.constant dense<0.000000e+00> : vector<16xf32>
    %128 = vector.multi_reduction <add>, %124, %cst_71 [1] : vector<16x16xf32> to vector<16xf32>
    %129 = vector.shape_cast %128 : vector<16xf32> to vector<16x1xf32>
    %130 = arith.addf %127, %129 : vector<16x1xf32>
    %c3_72 = arith.constant 3 : index
    %c0_73 = arith.constant 0 : index
    %c0_74 = arith.constant 0 : index
    %131 = vector.load %arg8[%c3_72, %c0_73, %c0_74] : memref<4x16x1xf32, #tpu.memory_space<vmem>>, vector<1x16x1xf32>
    %132 = vector.shape_cast %131 : vector<1x16x1xf32> to vector<16x1xf32>
    %133 = vector.shape_cast %130 : vector<16x1xf32> to vector<1x16x1xf32>
    tpu.vector_store %arg8[%c3_72, %c0_73, %c0_74], %133 {strides = array<i32>} : memref<4x16x1xf32, #tpu.memory_space<vmem>>, vector<1x16x1xf32>,
    %134 = arith.truncf %124 : vector<16x16xf32> to vector<16x16xbf16>
    %cst_75 = arith.constant dense<0.000000e+00> : vector<16x32xf32>
    %135 = tpu.matmul %134, %113, %cst_75 {dimension_numbers = #tpu.dot_dimension_numbers<[1], [0], [0], [1], [0, 0, 1, 1], [], []>} : vector<16x16xbf16>, vector<16x32xbf16>, vector<16x32xf32> -> vector<16x32xf32>
    %c0_76 = arith.constant 0 : index
    %c96 = arith.constant 96 : index
    %136 = vector.load %arg9[%c0_76, %c96] : memref<16x128xf32, #tpu.memory_space<vmem>>, vector<16x32xf32>
    %137 = vector.broadcast %121 : vector<16x1xf32> to vector<16x32xf32>
    %138 = arith.mulf %137, %136 : vector<16x32xf32>
    %139 = arith.addf %138, %135 : vector<16x32xf32>
    %c0_77 = arith.constant 0 : index
    %c96_78 = arith.constant 96 : index
    %140 = vector.load %arg9[%c0_77, %c96_78] : memref<16x128xf32, #tpu.memory_space<vmem>>, vector<16x32xf32>
    tpu.vector_store %arg9[%c0_77, %c96_78], %139 {strides = array<i32>} : memref<16x128xf32, #tpu.memory_space<vmem>>, vector<16x32xf32>,
    %c3_79 = arith.constant 3 : index
    %c0_80 = arith.constant 0 : index
    %c0_81 = arith.constant 0 : index
    %141 = vector.load %arg7[%c3_79, %c0_80, %c0_81] : memref<4x16x1xf32, #tpu.memory_space<vmem>>, vector<1x16x1xf32>
    %142 = vector.shape_cast %141 : vector<1x16x1xf32> to vector<16x1xf32>
    %143 = vector.shape_cast %119 : vector<16x1xf32> to vector<1x16x1xf32>
    tpu.vector_store %arg7[%c3_79, %c0_80, %c0_81], %143 {strides = array<i32>} : memref<4x16x1xf32, #tpu.memory_space<vmem>>, vector<1x16x1xf32>,
    %c0_i32_82 = arith.constant 0 : i32
    %144 = arith.cmpi eq, %arg2, %c0_i32_82 : i32
    %145 = arith.extui %144 : i1 to i32
    %c0_i32_83 = arith.constant 0 : i32
    %146 = arith.cmpi ne, %145, %c0_i32_83 : i32
    scf.if %146 {
      %c0_84 = arith.constant 0 : index
      %c0_85 = arith.constant 0 : index
      %c0_86 = arith.constant 0 : index
      %147 = vector.load %arg8[%c0_84, %c0_85, %c0_86] : memref<4x16x1xf32, #tpu.memory_space<vmem>>, vector<1x16x1xf32>
      %148 = vector.shape_cast %147 : vector<1x16x1xf32> to vector<16x1xf32>
      %149 = tpu.reciprocal %148 {approx = true} : vector<16x1xf32> -> vector<16x1xf32>
      %c0_87 = arith.constant 0 : index
      %c0_88 = arith.constant 0 : index
      %150 = vector.load %arg9[%c0_87, %c0_88] : memref<16x128xf32, #tpu.memory_space<vmem>>, vector<16x32xf32>
      %151 = vector.broadcast %149 : vector<16x1xf32> to vector<16x32xf32>
      %152 = arith.mulf %150, %151 : vector<16x32xf32>
      %c0_89 = arith.constant 0 : index
      %c0_90 = arith.constant 0 : index
      %153 = vector.load %arg9[%c0_89, %c0_90] : memref<16x128xf32, #tpu.memory_space<vmem>>, vector<16x32xf32>
      tpu.vector_store %arg9[%c0_89, %c0_90], %152 {strides = array<i32>} : memref<16x128xf32, #tpu.memory_space<vmem>>, vector<16x32xf32>,
      %c1_91 = arith.constant 1 : index
      %c0_92 = arith.constant 0 : index
      %c0_93 = arith.constant 0 : index
      %154 = vector.load %arg8[%c1_91, %c0_92, %c0_93] : memref<4x16x1xf32, #tpu.memory_space<vmem>>, vector<1x16x1xf32>
      %155 = vector.shape_cast %154 : vector<1x16x1xf32> to vector<16x1xf32>
      %156 = tpu.reciprocal %155 {approx = true} : vector<16x1xf32> -> vector<16x1xf32>
      %c0_94 = arith.constant 0 : index
      %c32_95 = arith.constant 32 : index
      %157 = vector.load %arg9[%c0_94, %c32_95] : memref<16x128xf32, #tpu.memory_space<vmem>>, vector<16x32xf32>
      %158 = vector.broadcast %156 : vector<16x1xf32> to vector<16x32xf32>
      %159 = arith.mulf %157, %158 : vector<16x32xf32>
      %c0_96 = arith.constant 0 : index
      %c32_97 = arith.constant 32 : index
      %160 = vector.load %arg9[%c0_96, %c32_97] : memref<16x128xf32, #tpu.memory_space<vmem>>, vector<16x32xf32>
      tpu.vector_store %arg9[%c0_96, %c32_97], %159 {strides = array<i32>} : memref<16x128xf32, #tpu.memory_space<vmem>>, vector<16x32xf32>,
      %c2_98 = arith.constant 2 : index
      %c0_99 = arith.constant 0 : index
      %c0_100 = arith.constant 0 : index
      %161 = vector.load %arg8[%c2_98, %c0_99, %c0_100] : memref<4x16x1xf32, #tpu.memory_space<vmem>>, vector<1x16x1xf32>
      %162 = vector.shape_cast %161 : vector<1x16x1xf32> to vector<16x1xf32>
      %163 = tpu.reciprocal %162 {approx = true} : vector<16x1xf32> -> vector<16x1xf32>
      %c0_101 = arith.constant 0 : index
      %c64_102 = arith.constant 64 : index
      %164 = vector.load %arg9[%c0_101, %c64_102] : memref<16x128xf32, #tpu.memory_space<vmem>>, vector<16x32xf32>
      %165 = vector.broadcast %163 : vector<16x1xf32> to vector<16x32xf32>
      %166 = arith.mulf %164, %165 : vector<16x32xf32>
      %c0_103 = arith.constant 0 : index
      %c64_104 = arith.constant 64 : index
      %167 = vector.load %arg9[%c0_103, %c64_104] : memref<16x128xf32, #tpu.memory_space<vmem>>, vector<16x32xf32>
      tpu.vector_store %arg9[%c0_103, %c64_104], %166 {strides = array<i32>} : memref<16x128xf32, #tpu.memory_space<vmem>>, vector<16x32xf32>,
      %c3_105 = arith.constant 3 : index
      %c0_106 = arith.constant 0 : index
      %c0_107 = arith.constant 0 : index
      %168 = vector.load %arg8[%c3_105, %c0_106, %c0_107] : memref<4x16x1xf32, #tpu.memory_space<vmem>>, vector<1x16x1xf32>
      %169 = vector.shape_cast %168 : vector<1x16x1xf32> to vector<16x1xf32>
      %170 = tpu.reciprocal %169 {approx = true} : vector<16x1xf32> -> vector<16x1xf32>
      %c0_108 = arith.constant 0 : index
      %c96_109 = arith.constant 96 : index
      %171 = vector.load %arg9[%c0_108, %c96_109] : memref<16x128xf32, #tpu.memory_space<vmem>>, vector<16x32xf32>
      %172 = vector.broadcast %170 : vector<16x1xf32> to vector<16x32xf32>
      %173 = arith.mulf %171, %172 : vector<16x32xf32>
      %c0_110 = arith.constant 0 : index
      %c96_111 = arith.constant 96 : index
      %174 = vector.load %arg9[%c0_110, %c96_111] : memref<16x128xf32, #tpu.memory_space<vmem>>, vector<16x32xf32>
      tpu.vector_store %arg9[%c0_110, %c96_111], %173 {strides = array<i32>} : memref<16x128xf32, #tpu.memory_space<vmem>>, vector<16x32xf32>,
      %c0_112 = arith.constant 0 : index
      %c0_113 = arith.constant 0 : index
      %175 = vector.load %arg9[%c0_112, %c0_113] : memref<16x128xf32, #tpu.memory_space<vmem>>, vector<16x128xf32>
      %c0_114 = arith.constant 0 : index
      %c0_115 = arith.constant 0 : index
      %c0_116 = arith.constant 0 : index
      %176 = vector.load %arg6[%c0_114, %c0_115, %c0_116] : memref<1x16x128xf32, #tpu.memory_space<vmem>>, vector<1x16x128xf32>
      %177 = vector.shape_cast %176 : vector<1x16x128xf32> to vector<16x128xf32>
      %178 = vector.shape_cast %175 : vector<16x128xf32> to vector<1x16x128xf32>
      tpu.vector_store %arg6[%c0_114, %c0_115, %c0_116], %178 {strides = array<i32>} : memref<1x16x128xf32, #tpu.memory_space<vmem>>, vector<1x16x128xf32>,
    } else {
    }
    return
  }
  func.func @transform_0(%arg0: i32, %arg1: i32, %arg2: i32) -> (i32, i32, i32) {
    %c0_i32 = arith.constant 0 : i32
    %c0_i32_0 = arith.constant 0 : i32
    return %arg0, %arg1, %c0_i32 : i32, i32, i32
  }
  func.func @transform_1(%arg0: i32, %arg1: i32, %arg2: i32) -> (i32, i32, i32) {
    %c1_i32 = arith.constant 1 : i32
    %c0_i32 = arith.constant 0 : i32
    return %arg0, %arg2, %c1_i32 : i32, i32, i32
  }
  func.func @transform_2(%arg0: i32, %arg1: i32, %arg2: i32) -> (i32, i32, i32) {
    %c2_i32 = arith.constant 2 : i32
    %c0_i32 = arith.constant 0 : i32
    return %arg0, %arg2, %c2_i32 : i32, i32, i32
  }
  func.func @transform_3(%arg0: i32, %arg1: i32, %arg2: i32) -> (i32, i32, i32) {
    %c0_i32 = arith.constant 0 : i32
    %c0_i32_0 = arith.constant 0 : i32
    return %arg0, %arg1, %c0_i32 : i32, i32, i32
  }
}

module attributes {stable_mosaic.version = 11 : i64} {
  func.func @_linear_kernel(%arg0: i32, %arg1: i32, %arg2: i32, %arg3: memref<32x128xf32, #tpu.memory_space<vmem>>, %arg4: memref<128x256xbf16, #tpu.memory_space<vmem>>, %arg5: memref<1x256xf32, #tpu.memory_space<vmem>>, %arg6: memref<32x256xf32, #tpu.memory_space<vmem>>, %arg7: memref<32x256xf32, #tpu.memory_space<vmem>>) attributes {dimension_semantics = [#tpu.dimension_semantics<parallel>, #tpu.dimension_semantics<parallel>, #tpu.dimension_semantics<arbitrary>], iteration_bounds = array<i64: 1, 1, 1>, scalar_prefetch = 0 : i64, scratch_operands = 1 : i64, tpu.core_type = #tpu.core_type<tc>, window_params = [{transform_indices = @transform_0, window_bounds = array<i64: 32, 128>}, {transform_indices = @transform_1, window_bounds = array<i64: 128, 256>}, {transform_indices = @transform_2, window_bounds = array<i64: 1, 256>}, {transform_indices = @transform_3, window_bounds = array<i64: 32, 256>}]} {
    %c0_i32 = arith.constant 0 : i32
    %0 = arith.cmpi eq, %arg2, %c0_i32 : i32
    %1 = arith.extui %0 : i1 to i32
    %c0_i32_0 = arith.constant 0 : i32
    %2 = arith.cmpi ne, %1, %c0_i32_0 : i32
    scf.if %2 {
      %cst_10 = arith.constant 0.000000e+00 : f32
      %13 = vector.broadcast %cst_10 : f32 to vector<32x256xf32>
      %c0_11 = arith.constant 0 : index
      %c0_12 = arith.constant 0 : index
      %14 = vector.load %arg7[%c0_11, %c0_12] : memref<32x256xf32, #tpu.memory_space<vmem>>, vector<32x256xf32>
      tpu.vector_store %arg7[%c0_11, %c0_12], %13 {strides = array<i32>} : memref<32x256xf32, #tpu.memory_space<vmem>>, vector<32x256xf32>,
    } else {
    }
    %c0 = arith.constant 0 : index
    %c0_1 = arith.constant 0 : index
    %3 = vector.load %arg7[%c0, %c0_1] : memref<32x256xf32, #tpu.memory_space<vmem>>, vector<32x256xf32>
    %c0_2 = arith.constant 0 : index
    %c0_3 = arith.constant 0 : index
    %4 = vector.load %arg3[%c0_2, %c0_3] : memref<32x128xf32, #tpu.memory_space<vmem>>, vector<32x128xf32>
    %5 = arith.truncf %4 : vector<32x128xf32> to vector<32x128xbf16>
    %c0_4 = arith.constant 0 : index
    %c0_5 = arith.constant 0 : index
    %6 = vector.load %arg4[%c0_4, %c0_5] : memref<128x256xbf16, #tpu.memory_space<vmem>>, vector<128x256xbf16>
    %cst = arith.constant dense<0.000000e+00> : vector<32x256xf32>
    %7 = tpu.matmul %5, %6, %cst {dimension_numbers = #tpu.dot_dimension_numbers<[1], [0], [0], [1], [0, 0, 1, 1], [], []>} : vector<32x128xbf16>, vector<128x256xbf16>, vector<32x256xf32> -> vector<32x256xf32>
    %8 = arith.addf %3, %7 : vector<32x256xf32>
    %c0_6 = arith.constant 0 : index
    %c0_7 = arith.constant 0 : index
    %9 = vector.load %arg7[%c0_6, %c0_7] : memref<32x256xf32, #tpu.memory_space<vmem>>, vector<32x256xf32>
    tpu.vector_store %arg7[%c0_6, %c0_7], %8 {strides = array<i32>} : memref<32x256xf32, #tpu.memory_space<vmem>>, vector<32x256xf32>,
    %c0_i32_8 = arith.constant 0 : i32
    %10 = arith.cmpi eq, %arg2, %c0_i32_8 : i32
    %11 = arith.extui %10 : i1 to i32
    %c0_i32_9 = arith.constant 0 : i32
    %12 = arith.cmpi ne, %11, %c0_i32_9 : i32
    scf.if %12 {
      %c0_10 = arith.constant 0 : index
      %c0_11 = arith.constant 0 : index
      %13 = vector.load %arg7[%c0_10, %c0_11] : memref<32x256xf32, #tpu.memory_space<vmem>>, vector<32x256xf32>
      %c0_12 = arith.constant 0 : index
      %c0_13 = arith.constant 0 : index
      %14 = vector.load %arg5[%c0_12, %c0_13] : memref<1x256xf32, #tpu.memory_space<vmem>>, vector<1x256xf32>
      %15 = vector.broadcast %14 : vector<1x256xf32> to vector<32x256xf32>
      %16 = arith.addf %13, %15 : vector<32x256xf32>
      %cst_14 = arith.constant 0.000000e+00 : f32
      %17 = vector.broadcast %cst_14 : f32 to vector<32x256xf32>
      %18 = arith.maximumf %16, %17 : vector<32x256xf32>
      %c0_15 = arith.constant 0 : index
      %c0_16 = arith.constant 0 : index
      %19 = vector.load %arg6[%c0_15, %c0_16] : memref<32x256xf32, #tpu.memory_space<vmem>>, vector<32x256xf32>
      tpu.vector_store %arg6[%c0_15, %c0_16], %18 {strides = array<i32>} : memref<32x256xf32, #tpu.memory_space<vmem>>, vector<32x256xf32>,
    } else {
    }
    return
  }
  func.func @transform_0(%arg0: i32, %arg1: i32, %arg2: i32) -> (i32, i32) {
    %c0_i32 = arith.constant 0 : i32
    return %arg0, %arg2 : i32, i32
  }
  func.func @transform_1(%arg0: i32, %arg1: i32, %arg2: i32) -> (i32, i32) {
    %c0_i32 = arith.constant 0 : i32
    return %arg2, %arg1 : i32, i32
  }
  func.func @transform_2(%arg0: i32, %arg1: i32, %arg2: i32) -> (i32, i32) {
    %c0_i32 = arith.constant 0 : i32
    %c0_i32_0 = arith.constant 0 : i32
    return %c0_i32, %arg1 : i32, i32
  }
  func.func @transform_3(%arg0: i32, %arg1: i32, %arg2: i32) -> (i32, i32) {
    %c0_i32 = arith.constant 0 : i32
    return %arg0, %arg1 : i32, i32
  }
}

module attributes {stable_mosaic.version = 11 : i64} {
  func.func @_matmul_resid_ln_kernel(%arg0: i32, %arg1: memref<32x128xf32, #tpu.memory_space<vmem>>, %arg2: memref<128x128xbf16, #tpu.memory_space<vmem>>, %arg3: memref<1x128xf32, #tpu.memory_space<vmem>>, %arg4: memref<32x128xf32, #tpu.memory_space<vmem>>, %arg5: memref<1x128xf32, #tpu.memory_space<vmem>>, %arg6: memref<1x128xf32, #tpu.memory_space<vmem>>, %arg7: memref<32x128xf32, #tpu.memory_space<vmem>>) attributes {dimension_semantics = [#tpu.dimension_semantics<parallel>], iteration_bounds = array<i64: 1>, scalar_prefetch = 0 : i64, scratch_operands = 0 : i64, tpu.core_type = #tpu.core_type<tc>, window_params = [{transform_indices = @transform_0, window_bounds = array<i64: 32, 128>}, {pipeline_mode = #tpu.pipeline_mode<synchronous>, transform_indices = @transform_1, window_bounds = array<i64: 128, 128>}, {pipeline_mode = #tpu.pipeline_mode<synchronous>, transform_indices = @transform_2, window_bounds = array<i64: 1, 128>}, {transform_indices = @transform_3, window_bounds = array<i64: 32, 128>}, {pipeline_mode = #tpu.pipeline_mode<synchronous>, transform_indices = @transform_4, window_bounds = array<i64: 1, 128>}, {pipeline_mode = #tpu.pipeline_mode<synchronous>, transform_indices = @transform_5, window_bounds = array<i64: 1, 128>}, {transform_indices = @transform_6, window_bounds = array<i64: 32, 128>}]} {
    %c0 = arith.constant 0 : index
    %c0_0 = arith.constant 0 : index
    %0 = vector.load %arg1[%c0, %c0_0] : memref<32x128xf32, #tpu.memory_space<vmem>>, vector<32x128xf32>
    %1 = arith.truncf %0 : vector<32x128xf32> to vector<32x128xbf16>
    %c0_1 = arith.constant 0 : index
    %c0_2 = arith.constant 0 : index
    %2 = vector.load %arg2[%c0_1, %c0_2] : memref<128x128xbf16, #tpu.memory_space<vmem>>, vector<128x128xbf16>
    %cst = arith.constant dense<0.000000e+00> : vector<32x128xf32>
    %3 = tpu.matmul %1, %2, %cst {dimension_numbers = #tpu.dot_dimension_numbers<[1], [0], [0], [1], [0, 0, 1, 1], [], []>} : vector<32x128xbf16>, vector<128x128xbf16>, vector<32x128xf32> -> vector<32x128xf32>
    %c0_3 = arith.constant 0 : index
    %c0_4 = arith.constant 0 : index
    %4 = vector.load %arg3[%c0_3, %c0_4] : memref<1x128xf32, #tpu.memory_space<vmem>>, vector<1x128xf32>
    %5 = vector.broadcast %4 : vector<1x128xf32> to vector<32x128xf32>
    %6 = arith.addf %3, %5 : vector<32x128xf32>
    %c0_5 = arith.constant 0 : index
    %c0_6 = arith.constant 0 : index
    %7 = vector.load %arg4[%c0_5, %c0_6] : memref<32x128xf32, #tpu.memory_space<vmem>>, vector<32x128xf32>
    %8 = arith.addf %6, %7 : vector<32x128xf32>
    %cst_7 = arith.constant dense<0.000000e+00> : vector<32xf32>
    %9 = vector.multi_reduction <add>, %8, %cst_7 [1] : vector<32x128xf32> to vector<32xf32>
    %10 = vector.shape_cast %9 : vector<32xf32> to vector<32x1xf32>
    %cst_8 = arith.constant 1.280000e+02 : f32
    %11 = vector.broadcast %cst_8 : f32 to vector<32x1xf32>
    %12 = arith.divf %10, %11 : vector<32x1xf32>
    %13 = vector.broadcast %12 : vector<32x1xf32> to vector<32x128xf32>
    %14 = arith.subf %8, %13 : vector<32x128xf32>
    %15 = arith.mulf %14, %14 : vector<32x128xf32>
    %cst_9 = arith.constant dense<0.000000e+00> : vector<32xf32>
    %16 = vector.multi_reduction <add>, %15, %cst_9 [1] : vector<32x128xf32> to vector<32xf32>
    %17 = vector.shape_cast %16 : vector<32xf32> to vector<32x1xf32>
    %cst_10 = arith.constant 1.280000e+02 : f32
    %18 = vector.broadcast %cst_10 : f32 to vector<32x1xf32>
    %19 = arith.divf %17, %18 : vector<32x1xf32>
    %cst_11 = arith.constant 9.99999974E-6 : f32
    %20 = vector.broadcast %cst_11 : f32 to vector<32x1xf32>
    %21 = arith.addf %19, %20 : vector<32x1xf32>
    %22 = math.rsqrt %21 : vector<32x1xf32>
    %23 = vector.broadcast %22 : vector<32x1xf32> to vector<32x128xf32>
    %24 = arith.mulf %14, %23 : vector<32x128xf32>
    %c0_12 = arith.constant 0 : index
    %c0_13 = arith.constant 0 : index
    %25 = vector.load %arg5[%c0_12, %c0_13] : memref<1x128xf32, #tpu.memory_space<vmem>>, vector<1x128xf32>
    %26 = vector.broadcast %25 : vector<1x128xf32> to vector<32x128xf32>
    %27 = arith.mulf %24, %26 : vector<32x128xf32>
    %c0_14 = arith.constant 0 : index
    %c0_15 = arith.constant 0 : index
    %28 = vector.load %arg6[%c0_14, %c0_15] : memref<1x128xf32, #tpu.memory_space<vmem>>, vector<1x128xf32>
    %29 = vector.broadcast %28 : vector<1x128xf32> to vector<32x128xf32>
    %30 = arith.addf %27, %29 : vector<32x128xf32>
    %c0_16 = arith.constant 0 : index
    %c0_17 = arith.constant 0 : index
    %31 = vector.load %arg7[%c0_16, %c0_17] : memref<32x128xf32, #tpu.memory_space<vmem>>, vector<32x128xf32>
    tpu.vector_store %arg7[%c0_16, %c0_17], %30 {strides = array<i32>} : memref<32x128xf32, #tpu.memory_space<vmem>>, vector<32x128xf32>,
    return
  }
  func.func @transform_0(%arg0: i32) -> (i32, i32) {
    %c0_i32 = arith.constant 0 : i32
    %c0_i32_0 = arith.constant 0 : i32
    return %arg0, %c0_i32 : i32, i32
  }
  func.func @transform_1(%arg0: i32) -> (i32, i32) {
    %c0_i32 = arith.constant 0 : i32
    %c0_i32_0 = arith.constant 0 : i32
    %c0_i32_1 = arith.constant 0 : i32
    return %c0_i32, %c0_i32_0 : i32, i32
  }
  func.func @transform_2(%arg0: i32) -> (i32, i32) {
    %c0_i32 = arith.constant 0 : i32
    %c0_i32_0 = arith.constant 0 : i32
    %c0_i32_1 = arith.constant 0 : i32
    return %c0_i32, %c0_i32_0 : i32, i32
  }
  func.func @transform_3(%arg0: i32) -> (i32, i32) {
    %c0_i32 = arith.constant 0 : i32
    %c0_i32_0 = arith.constant 0 : i32
    return %arg0, %c0_i32 : i32, i32
  }
  func.func @transform_4(%arg0: i32) -> (i32, i32) {
    %c0_i32 = arith.constant 0 : i32
    %c0_i32_0 = arith.constant 0 : i32
    %c0_i32_1 = arith.constant 0 : i32
    return %c0_i32, %c0_i32_0 : i32, i32
  }
  func.func @transform_5(%arg0: i32) -> (i32, i32) {
    %c0_i32 = arith.constant 0 : i32
    %c0_i32_0 = arith.constant 0 : i32
    %c0_i32_1 = arith.constant 0 : i32
    return %c0_i32, %c0_i32_0 : i32, i32
  }
  func.func @transform_6(%arg0: i32) -> (i32, i32) {
    %c0_i32 = arith.constant 0 : i32
    %c0_i32_0 = arith.constant 0 : i32
    return %arg0, %c0_i32 : i32, i32
  }
}

module attributes {stable_mosaic.version = 11 : i64} {
  func.func @_matmul_resid_ln_kernel(%arg0: i32, %arg1: memref<32x256xf32, #tpu.memory_space<vmem>>, %arg2: memref<256x128xbf16, #tpu.memory_space<vmem>>, %arg3: memref<1x128xf32, #tpu.memory_space<vmem>>, %arg4: memref<32x128xf32, #tpu.memory_space<vmem>>, %arg5: memref<1x128xf32, #tpu.memory_space<vmem>>, %arg6: memref<1x128xf32, #tpu.memory_space<vmem>>, %arg7: memref<32x128xf32, #tpu.memory_space<vmem>>) attributes {dimension_semantics = [#tpu.dimension_semantics<parallel>], iteration_bounds = array<i64: 1>, scalar_prefetch = 0 : i64, scratch_operands = 0 : i64, tpu.core_type = #tpu.core_type<tc>, window_params = [{transform_indices = @transform_0, window_bounds = array<i64: 32, 256>}, {pipeline_mode = #tpu.pipeline_mode<synchronous>, transform_indices = @transform_1, window_bounds = array<i64: 256, 128>}, {pipeline_mode = #tpu.pipeline_mode<synchronous>, transform_indices = @transform_2, window_bounds = array<i64: 1, 128>}, {transform_indices = @transform_3, window_bounds = array<i64: 32, 128>}, {pipeline_mode = #tpu.pipeline_mode<synchronous>, transform_indices = @transform_4, window_bounds = array<i64: 1, 128>}, {pipeline_mode = #tpu.pipeline_mode<synchronous>, transform_indices = @transform_5, window_bounds = array<i64: 1, 128>}, {transform_indices = @transform_6, window_bounds = array<i64: 32, 128>}]} {
    %c0 = arith.constant 0 : index
    %c0_0 = arith.constant 0 : index
    %0 = vector.load %arg1[%c0, %c0_0] : memref<32x256xf32, #tpu.memory_space<vmem>>, vector<32x256xf32>
    %1 = arith.truncf %0 : vector<32x256xf32> to vector<32x256xbf16>
    %c0_1 = arith.constant 0 : index
    %c0_2 = arith.constant 0 : index
    %2 = vector.load %arg2[%c0_1, %c0_2] : memref<256x128xbf16, #tpu.memory_space<vmem>>, vector<256x128xbf16>
    %cst = arith.constant dense<0.000000e+00> : vector<32x128xf32>
    %3 = tpu.matmul %1, %2, %cst {dimension_numbers = #tpu.dot_dimension_numbers<[1], [0], [0], [1], [0, 0, 1, 1], [], []>} : vector<32x256xbf16>, vector<256x128xbf16>, vector<32x128xf32> -> vector<32x128xf32>
    %c0_3 = arith.constant 0 : index
    %c0_4 = arith.constant 0 : index
    %4 = vector.load %arg3[%c0_3, %c0_4] : memref<1x128xf32, #tpu.memory_space<vmem>>, vector<1x128xf32>
    %5 = vector.broadcast %4 : vector<1x128xf32> to vector<32x128xf32>
    %6 = arith.addf %3, %5 : vector<32x128xf32>
    %c0_5 = arith.constant 0 : index
    %c0_6 = arith.constant 0 : index
    %7 = vector.load %arg4[%c0_5, %c0_6] : memref<32x128xf32, #tpu.memory_space<vmem>>, vector<32x128xf32>
    %8 = arith.addf %6, %7 : vector<32x128xf32>
    %cst_7 = arith.constant dense<0.000000e+00> : vector<32xf32>
    %9 = vector.multi_reduction <add>, %8, %cst_7 [1] : vector<32x128xf32> to vector<32xf32>
    %10 = vector.shape_cast %9 : vector<32xf32> to vector<32x1xf32>
    %cst_8 = arith.constant 1.280000e+02 : f32
    %11 = vector.broadcast %cst_8 : f32 to vector<32x1xf32>
    %12 = arith.divf %10, %11 : vector<32x1xf32>
    %13 = vector.broadcast %12 : vector<32x1xf32> to vector<32x128xf32>
    %14 = arith.subf %8, %13 : vector<32x128xf32>
    %15 = arith.mulf %14, %14 : vector<32x128xf32>
    %cst_9 = arith.constant dense<0.000000e+00> : vector<32xf32>
    %16 = vector.multi_reduction <add>, %15, %cst_9 [1] : vector<32x128xf32> to vector<32xf32>
    %17 = vector.shape_cast %16 : vector<32xf32> to vector<32x1xf32>
    %cst_10 = arith.constant 1.280000e+02 : f32
    %18 = vector.broadcast %cst_10 : f32 to vector<32x1xf32>
    %19 = arith.divf %17, %18 : vector<32x1xf32>
    %cst_11 = arith.constant 9.99999974E-6 : f32
    %20 = vector.broadcast %cst_11 : f32 to vector<32x1xf32>
    %21 = arith.addf %19, %20 : vector<32x1xf32>
    %22 = math.rsqrt %21 : vector<32x1xf32>
    %23 = vector.broadcast %22 : vector<32x1xf32> to vector<32x128xf32>
    %24 = arith.mulf %14, %23 : vector<32x128xf32>
    %c0_12 = arith.constant 0 : index
    %c0_13 = arith.constant 0 : index
    %25 = vector.load %arg5[%c0_12, %c0_13] : memref<1x128xf32, #tpu.memory_space<vmem>>, vector<1x128xf32>
    %26 = vector.broadcast %25 : vector<1x128xf32> to vector<32x128xf32>
    %27 = arith.mulf %24, %26 : vector<32x128xf32>
    %c0_14 = arith.constant 0 : index
    %c0_15 = arith.constant 0 : index
    %28 = vector.load %arg6[%c0_14, %c0_15] : memref<1x128xf32, #tpu.memory_space<vmem>>, vector<1x128xf32>
    %29 = vector.broadcast %28 : vector<1x128xf32> to vector<32x128xf32>
    %30 = arith.addf %27, %29 : vector<32x128xf32>
    %c0_16 = arith.constant 0 : index
    %c0_17 = arith.constant 0 : index
    %31 = vector.load %arg7[%c0_16, %c0_17] : memref<32x128xf32, #tpu.memory_space<vmem>>, vector<32x128xf32>
    tpu.vector_store %arg7[%c0_16, %c0_17], %30 {strides = array<i32>} : memref<32x128xf32, #tpu.memory_space<vmem>>, vector<32x128xf32>,
    return
  }
  func.func @transform_0(%arg0: i32) -> (i32, i32) {
    %c0_i32 = arith.constant 0 : i32
    %c0_i32_0 = arith.constant 0 : i32
    return %arg0, %c0_i32 : i32, i32
  }
  func.func @transform_1(%arg0: i32) -> (i32, i32) {
    %c0_i32 = arith.constant 0 : i32
    %c0_i32_0 = arith.constant 0 : i32
    %c0_i32_1 = arith.constant 0 : i32
    return %c0_i32, %c0_i32_0 : i32, i32
  }
  func.func @transform_2(%arg0: i32) -> (i32, i32) {
    %c0_i32 = arith.constant 0 : i32
    %c0_i32_0 = arith.constant 0 : i32
    %c0_i32_1 = arith.constant 0 : i32
    return %c0_i32, %c0_i32_0 : i32, i32
  }
  func.func @transform_3(%arg0: i32) -> (i32, i32) {
    %c0_i32 = arith.constant 0 : i32
    %c0_i32_0 = arith.constant 0 : i32
    return %arg0, %c0_i32 : i32, i32
  }
  func.func @transform_4(%arg0: i32) -> (i32, i32) {
    %c0_i32 = arith.constant 0 : i32
    %c0_i32_0 = arith.constant 0 : i32
    %c0_i32_1 = arith.constant 0 : i32
    return %c0_i32, %c0_i32_0 : i32, i32
  }
  func.func @transform_5(%arg0: i32) -> (i32, i32) {
    %c0_i32 = arith.constant 0 : i32
    %c0_i32_0 = arith.constant 0 : i32
    %c0_i32_1 = arith.constant 0 : i32
    return %c0_i32, %c0_i32_0 : i32, i32
  }
  func.func @transform_6(%arg0: i32) -> (i32, i32) {
    %c0_i32 = arith.constant 0 : i32
    %c0_i32_0 = arith.constant 0 : i32
    return %arg0, %c0_i32 : i32, i32
  }
}

</mosaic_0001>

<bundles_post_ra>
// kernel: transformer_sentence_encoder_layer.7
= control target key start
LH: loop header
LB: loop body
LE: loop exit
PB: predicated region body
PF: predicated region fallthrough
CT: control target
= control target key end

     0   :  { %s394_s1 = inlined_call_operand.vmem [shape: bf16[128,128], index: 1, kind: input, shape index: {}]   ;;  %s395_s0 = inlined_call_operand.vmem [shape: f32[32,128], index: 0, kind: input, shape index: {}]   ;;  %s396_s2 = inlined_call_operand.vmem [shape: f32[1,128], index: 2, kind: input, shape index: {}]   ;;  %s397_s3 = inlined_call_operand.vmem [shape: f32[32,128], index: 3, kind: input, shape index: {}]   ;;  %s398_s4 = inlined_call_operand.vmem [shape: f32[1,128], index: 4, kind: input, shape index: {}]   ;;  %s399_s5 = inlined_call_operand.vmem [shape: f32[1,128], index: 5, kind: input, shape index: {}]   ;;  %s400_s6 = inlined_call_operand.vmem [shape: f32[32,128], index: 6, kind: output, shape index: {}]  }
   0x1   :  { %v274_v0 = vld [vmem:[%s394_s1 + $0x38] sm:$0xff]   ;;  %v275_v1 = vld [vmem:[%s394_s1 + $0x30] sm:$0xff]   ;;  %v276_v2 = vld [vmem:[%s394_s1 + $0x28] sm:$0xff]  }
   0x2   :  { %254 = vmatprep.subr.bf16.mxu0 %v274_v0  ;;  %v277_v3 = vld [vmem:[%s394_s1 + $0x20] sm:$0xff]   ;;  %v25_v5 = vld [vmem:[%s395_s0 + $0x8] sm:$0xff]  ;;  %v278_v7 = vld [vmem:[%s394_s1 + $0x18] sm:$0xff]  }
   0x3   :  { %255 = vmatpush3.bf16.msra.mxu0 %v274_v0  ;;  %v24_v4 = vld [vmem:[%s395_s0] sm:$0xff]  ;;  %v279_v8 = vld [vmem:[%s394_s1 + $0x10] sm:$0xff]   ;;  %v280_v9 = vld [vmem:[%s394_s1 + $0x8] sm:$0xff]  }
   0x4   :  { %256 = vmatprep.subr.bf16.mxu0 %v275_v1  ;;  %v28_v6 = vpack.c.bf16 %v25_v5, %v24_v4  ;;  %v281_v10 = vld [vmem:[%s394_s1] sm:$0xff]   ;;  %v26_v11 = vld [vmem:[%s395_s0 + $0x10] sm:$0xff]  ;;  %v27_v12 = vld [vmem:[%s395_s0 + $0x18] sm:$0xff] }
   0x5   :  { %v29_v13 = vpack.c.bf16 %v27_v12, %v26_v11  ;;  %v233_v14 = vld [vmem:[%s396_s2] ss:$0 sm:$0xff]  ;;  %v152_v16 = vld [vmem:[%s397_s3 + $0x10] sm:$0xff]  ;;  %v153_v23 = vld [vmem:[%s397_s3 + $0x18] sm:$0xff] }
   0x6   :  { %270 = vmatprep.mubr.bf16.mxu0 %v28_v6  ;;  %v150_v19 = vld [vmem:[%s397_s3] sm:$0xff]  ;;  %v151_v27 = vld [vmem:[%s397_s3 + $0x8] sm:$0xff] }
   0x7   :  { %257 = vmatpush3.bf16.msra.mxu0 %v275_v1  ;;  %v242_v60 = vld [vmem:[%s398_s4] ss:$0 sm:$0xff] }
   0x8   :  { %258 = vmatprep.subr.bf16.mxu0 %v276_v2  ;;  %v243_v62 = vld [vmem:[%s399_s5] ss:$0 sm:$0xff] }
   0xb   :  { %259 = vmatpush3.bf16.msra.mxu0 %v276_v2 }
   0xc   :  { %260 = vmatprep.subr.bf16.mxu0 %v277_v3 }
   0xf   :  { %261 = vmatpush3.bf16.msra.mxu0 %v277_v3 }
  0x10   :  { %262 = vmatprep.subr.bf16.mxu0 %v278_v7 }
  0x13   :  { %263 = vmatpush3.bf16.msra.mxu0 %v278_v7 }
  0x14   :  { %264 = vmatprep.subr.bf16.mxu0 %v279_v8 }
  0x17   :  { %265 = vmatpush3.bf16.msra.mxu0 %v279_v8 }
  0x18   :  { %266 = vmatprep.subr.bf16.mxu0 %v280_v9 }
  0x1b   :  { %267 = vmatpush3.bf16.msra.mxu0 %v280_v9 }
  0x1c   :  { %268 = vmatprep.subr.bf16.mxu0 %v281_v10 }
  0x1f   :  { %269 = vmatpush3.bf16.msra.mxu0 %v281_v10 }
  0x22   :  { %271 = vmatmul.mubr.bf16.vlgmr.msra.gmra.mxu0 %v29_v13 }
  0xe2   :  { %v272_v15 = vpop.f32.mrf.mxu0 }
  0xe3   :  { %v144_v17 = vadd.f32 %v272_v15, %v233_v14 }
  0xe4   :  { %v135_v18 = vpop.f32.mrf.mxu0 }
  0xe5   :  { %v136_v20 = vadd.f32 %v233_v14, %v135_v18  ;;  %v156_v21 = vadd.f32 %v152_v16, %v144_v17 }
  0xe6   :  { %v273_v22 = vpop.f32.mrf.mxu0 }
  0xe7   :  { %v147_v24 = vadd.f32 %v273_v22, %v233_v14  ;;  %162 = vadd.xlane.f32.xlu1 %v156_v21  ;;  %v154_v25 = vadd.f32 %v150_v19, %v136_v20 }
  0xe8   :  { %v138_v26 = vpop.f32.mrf.mxu0 }
  0xe9   :  { %v139_v28 = vadd.f32 %v233_v14, %v138_v26  ;;  %158 = vadd.xlane.f32.xlu0 %v154_v25  ;;  %v157_v29 = vadd.f32 %v153_v23, %v147_v24 }
  0xeb   :  { %164 = vadd.xlane.f32.xlu1 %v157_v29  ;;  %v155_v30 = vadd.f32 %v151_v27, %v139_v28 }
  0xed   :  { %160 = vadd.xlane.f32.xlu0 %v155_v30 }
 0x170   :  { %v163_v31 = vpop.xlane.xlu1 %162 }
 0x171   :  { %v169_v33 = vmul.f32 0.0078125, %v163_v31 }
 0x172   :  { %v159_v32 = vpop.xlane.xlu0 %158 }
 0x173   :  { %v167_v34 = vmul.f32 0.0078125, %v159_v32  ;;  %v173_v38 = vsub.f32 %v156_v21, %v169_v33 }
 0x174   :  { %v165_v35 = vpop.xlane.xlu1 %164 }
 0x175   :  { %v171_v36 = vsub.f32 %v154_v25, %v167_v34  ;;  %v170_v39 = vmul.f32 0.0078125, %v165_v35  ;;  %v177_v44 = vmul.f32 %v173_v38, %v173_v38 }
 0x176   :  { %v161_v37 = vpop.xlane.xlu0 %160 }
 0x177   :  { %v168_v40 = vmul.f32 0.0078125, %v161_v37  ;;  %v175_v41 = vmul.f32 %v171_v36, %v171_v36  ;;  %v174_v43 = vsub.f32 %v157_v29, %v170_v39 }
 0x179   :  { %v172_v42 = vsub.f32 %v155_v30, %v168_v40  ;;  %179 = vadd.xlane.f32.xlu0 %v175_v41  ;;  %v178_v46 = vmul.f32 %v174_v43, %v174_v43 }
 0x17b   :  { %v176_v45 = vmul.f32 %v172_v42, %v172_v42 }
 0x17d   :  { %183 = vadd.xlane.f32.xlu0 %v177_v44  ;;  %181 = vadd.xlane.f32.xlu1 %v176_v45 }
 0x181   :  { %185 = vadd.xlane.f32.xlu1 %v178_v46 }
 0x202   :  { %v180_v47 = vpop.xlane.xlu0 %179 }
 0x203   :  { %v187_v48 = vmul.f32 0.0078125, %v180_v47 }
 0x205   :  { %v191_v49 = vadd.f32 1e-05, %v187_v48 }
 0x206   :  { %v182_v50 = vpop.xlane.xlu1 %181  ;;  %v184_v51 = vpop.xlane.xlu0 %183 }
 0x207   :  { %282 = vrsqrt.f32 %v191_v49  ;;  %v188_v52 = vmul.f32 0.0078125, %v182_v50  ;;  %v189_v53 = vmul.f32 0.0078125, %v184_v51 }
 0x209   :  { %v192_v54 = vadd.f32 1e-05, %v188_v52  ;;  %v193_v55 = vadd.f32 1e-05, %v189_v53 }
 0x20a   :  { %v186_v56 = vpop.xlane.xlu1 %185 }
 0x20b   :  { %284 = vrsqrt.f32 %v192_v54  ;;  %v190_v57 = vmul.f32 0.0078125, %v186_v56 }
 0x20c   :  { %286 = vrsqrt.f32 %v193_v55 }
 0x20d   :  { %v194_v58 = vadd.f32 1e-05, %v190_v57 }
 0x20f   :  { %288 = vrsqrt.f32 %v194_v58 }
 0x214   :  { %v283_v59 = vpop.eup %282 }
 0x215   :  { %v199_v61 = vmul.f32 %v283_v59, %v171_v36 }
 0x217   :  { %v210_v63 = vmul.f32 %v242_v60, %v199_v61 }
 0x218   :  { %v285_v0 = vpop.eup %284 }
 0x219   :  { %v287_v1 = vpop.eup %286  ;;  %v221_v2 = vadd.f32 %v243_v62, %v210_v63  ;;  %v200_v3 = vmul.f32 %v285_v0, %v172_v42 }
 0x21a   :  { %v201_v4 = vmul.f32 %v287_v1, %v173_v38 }
 0x21b   :  { %225 = vst [vmem:[%s400_s6] sm:$0xff] %v221_v2  ;;  %v211_v5 = vmul.f32 %v242_v60, %v200_v3 }
 0x21c   :  { %v289_v6 = vpop.eup %288  ;;  %v212_v7 = vmul.f32 %v242_v60, %v201_v4 }
 0x21d   :  { %v222_v8 = vadd.f32 %v243_v62, %v211_v5  ;;  %v202_v9 = vmul.f32 %v289_v6, %v174_v43 }
 0x21e   :  { %v223_v10 = vadd.f32 %v243_v62, %v212_v7 }
 0x21f   :  { %226 = vst [vmem:[%s400_s6 + $0x8] sm:$0xff] %v222_v8  ;;  %v213_v11 = vmul.f32 %v242_v60, %v202_v9 }
 0x220   :  { %227 = vst [vmem:[%s400_s6 + $0x10] sm:$0xff] %v223_v10 }
 0x221   :  { %v224_v12 = vadd.f32 %v243_v62, %v213_v11 }
 0x223   :  { %228 = vst [vmem:[%s400_s6 + $0x18] sm:$0xff] %v224_v12 }

// kernel: transformer_sentence_encoder_layer.8
= control target key start
LH: loop header
LB: loop body
LE: loop exit
PB: predicated region body
PF: predicated region fallthrough
CT: control target
= control target key end

     0   :  { %v314_v1 = vmov 0   ;;  %v219_v23 = vlaneseq  ;;  %s422_s1 = inlined_call_operand.vmem [shape: bf16[128,256], index: 1, kind: input, shape index: {}]   ;;  %s423_s0 = inlined_call_operand.vmem [shape: f32[32,128], index: 0, kind: input, shape index: {}]   ;;  %s424_s2 = inlined_call_operand.vmem [shape: f32[1,256], index: 2, kind: input, shape index: {}]   ;;  %s425_s3 = inlined_call_operand.vmem [shape: f32[32,256], index: 3, kind: output, shape index: {}]  }
   0x1   :  { %v290_v0 = vld [vmem:[%s422_s1 + $0x74] ss:$8 sps:$4 sm:$0xff]   ;;  %169 = vmatprep.mubr.bf16.mxu0 %v314_v1  ;;  %179 = vmatprep.mubr.bf16.mxu1 %v314_v1  ;;  %v292_v2 = vld [vmem:[%s422_s1 + $0x70] ss:$8 sps:$4 sm:$0xff]   ;;  %v293_v3 = vld [vmem:[%s422_s1 + $0x64] ss:$8 sps:$4 sm:$0xff]  }
   0x2   :  { %137 = vmatprep.subr.bf16.mxu0 %v290_v0  ;;  %273 = vmatprep.subr.bf16.mxu1 %v290_v0  ;;  %v295_v4 = vld [vmem:[%s422_s1 + $0x60] ss:$8 sps:$4 sm:$0xff]   ;;  %v296_v5 = vld [vmem:[%s422_s1 + $0x54] ss:$8 sps:$4 sm:$0xff]   ;;  %v298_v6 = vld [vmem:[%s422_s1 + $0x50] ss:$8 sps:$4 sm:$0xff]  }
   0x3   :  { %138 = vmatpush1.bf16.msra.mxu0 %v292_v2  ;;  %281 = vmatpush1.bf16.msra.mxu1 %v292_v2  ;;  %v299_v7 = vld [vmem:[%s422_s1 + $0x44] ss:$8 sps:$4 sm:$0xff]   ;;  %v301_v8 = vld [vmem:[%s422_s1 + $0x40] ss:$8 sps:$4 sm:$0xff]   ;;  %v302_v9 = vld [vmem:[%s422_s1 + $0x34] ss:$8 sps:$4 sm:$0xff]  }
   0x4   :  { %139 = vmatprep.subr.bf16.mxu0 %v293_v3  ;;  %274 = vmatprep.subr.bf16.mxu1 %v293_v3  ;;  %v304_v10 = vld [vmem:[%s422_s1 + $0x30] ss:$8 sps:$4 sm:$0xff]   ;;  %v305_v11 = vld [vmem:[%s422_s1 + $0x24] ss:$8 sps:$4 sm:$0xff]   ;;  %v307_v12 = vld [vmem:[%s422_s1 + $0x20] ss:$8 sps:$4 sm:$0xff]  }
   0x5   :  { %v308_v13 = vld [vmem:[%s422_s1 + $0x14] ss:$8 sps:$4 sm:$0xff]   ;;  %v310_v14 = vld [vmem:[%s422_s1 + $0x10] ss:$8 sps:$4 sm:$0xff]   ;;  %v311_v15 = vld [vmem:[%s422_s1 + $0x4] ss:$8 sps:$4 sm:$0xff]  }
   0x6   :  { %v313_v16 = vld [vmem:[%s422_s1] ss:$8 sps:$4 sm:$0xff]   ;;  %v37_v19 = vld [vmem:[%s423_s0 + $0x10] sm:$0xff]  ;;  %v38_v20 = vld [vmem:[%s423_s0 + $0x18] sm:$0xff]  ;;  %v220_v24 = vshrl.u32 %v219_v23, 7 }
   0x7   :  { %140 = vmatpush1.bf16.msra.mxu0 %v295_v4  ;;  %282 = vmatpush1.bf16.msra.mxu1 %v295_v4  ;;  %v35_v17 = vld [vmem:[%s423_s0] sm:$0xff]  ;;  %v36_v18 = vld [vmem:[%s423_s0 + $0x8] sm:$0xff]  ;;  %v40_v22 = vpack.c.bf16 %v38_v20, %v37_v19 }
   0x8   :  { %141 = vmatprep.subr.bf16.mxu0 %v296_v5  ;;  %275 = vmatprep.subr.bf16.mxu1 %v296_v5  ;;  %v39_v21 = vpack.c.bf16 %v36_v18, %v35_v17  ;;  %v221_v25 = vsub.s32 0, %v220_v24  ;;  %v217_v26 = vld [vmem:[%s424_s2] sm:$0x3]  ;;  %v225_v27 = vsub.s32 1, %v220_v24 }
   0xa   :  { %v222_v28 = vrot.slane %v217_v26, %v221_v25  ;;  %v226_v29 = vrot.slane %v217_v26, %v225_v27 }
   0xb   :  { %142 = vmatpush1.bf16.msra.mxu0 %v298_v6  ;;  %283 = vmatpush1.bf16.msra.mxu1 %v298_v6 }
   0xc   :  { %143 = vmatprep.subr.bf16.mxu0 %v299_v7  ;;  %276 = vmatprep.subr.bf16.mxu1 %v299_v7 }
   0xf   :  { %144 = vmatpush1.bf16.msra.mxu0 %v301_v8  ;;  %284 = vmatpush1.bf16.msra.mxu1 %v301_v8 }
  0x10   :  { %145 = vmatprep.subr.bf16.mxu0 %v302_v9  ;;  %277 = vmatprep.subr.bf16.mxu1 %v302_v9 }
  0x13   :  { %146 = vmatpush1.bf16.msra.mxu0 %v304_v10  ;;  %285 = vmatpush1.bf16.msra.mxu1 %v304_v10 }
  0x14   :  { %147 = vmatprep.subr.bf16.mxu0 %v305_v11  ;;  %278 = vmatprep.subr.bf16.mxu1 %v305_v11 }
  0x17   :  { %148 = vmatpush1.bf16.msra.mxu0 %v307_v12  ;;  %286 = vmatpush1.bf16.msra.mxu1 %v307_v12 }
  0x18   :  { %149 = vmatprep.subr.bf16.mxu0 %v308_v13  ;;  %279 = vmatprep.subr.bf16.mxu1 %v308_v13 }
  0x1b   :  { %150 = vmatpush1.bf16.msra.mxu0 %v310_v14  ;;  %287 = vmatpush1.bf16.msra.mxu1 %v310_v14 }
  0x1c   :  { %151 = vmatprep.subr.bf16.mxu0 %v311_v15  ;;  %280 = vmatprep.subr.bf16.mxu1 %v311_v15 }
  0x1f   :  { %152 = vmatpush1.bf16.msra.mxu0 %v313_v16  ;;  %288 = vmatpush1.bf16.msra.mxu1 %v313_v16 }
  0x22   :  { %170 = vmatmul.mubr.bf16.vlgmr.msra.gmra.mxu0 %v39_v21  ;;  %180 = vmatmul.mubr.bf16.vlgmr.msra.gmra.mxu1 %v40_v22 }
  0xe2   :  { %v171_v30 = vpop.f32.mrf.mxu0  ;;  %v181_v31 = vpop.f32.mrf.mxu1 }
  0xe3   :  { %v229_v32 = vadd.f32 %v222_v28, %v171_v30  ;;  %v233_v33 = vadd.f32 %v222_v28, %v181_v31 }
  0xe4   :  { %v173_v34 = vpop.f32.mrf.mxu0  ;;  %v183_v35 = vpop.f32.mrf.mxu1 }
  0xe5   :  { %v237_v36 = vmax.f32 %v229_v32, 0.0  ;;  %v241_v37 = vmax.f32 %v233_v33, 0.0  ;;  %v230_v38 = vadd.f32 %v226_v29, %v173_v34  ;;  %v234_v39 = vadd.f32 %v226_v29, %v183_v35 }
  0xe6   :  { %v175_v40 = vpop.f32.mrf.mxu0  ;;  %v185_v41 = vpop.f32.mrf.mxu1 }
  0xe7   :  { %245 = vst [vmem:[%s425_s3] sm:$0xff] %v237_v36  ;;  %249 = vst [vmem:[%s425_s3 + $0x20] sm:$0xff] %v241_v37  ;;  %v238_v42 = vmax.f32 %v230_v38, 0.0  ;;  %v242_v43 = vmax.f32 %v234_v39, 0.0  ;;  %v231_v44 = vadd.f32 %v222_v28, %v175_v40  ;;  %v235_v45 = vadd.f32 %v222_v28, %v185_v41 }
  0xe8   :  { %v177_v46 = vpop.f32.mrf.mxu0  ;;  %v187_v47 = vpop.f32.mrf.mxu1 }
  0xe9   :  { %246 = vst [vmem:[%s425_s3 + $0x8] sm:$0xff] %v238_v42  ;;  %250 = vst [vmem:[%s425_s3 + $0x28] sm:$0xff] %v242_v43  ;;  %v239_v48 = vmax.f32 %v231_v44, 0.0  ;;  %v243_v49 = vmax.f32 %v235_v45, 0.0  ;;  %v232_v50 = vadd.f32 %v226_v29, %v177_v46  ;;  %v236_v51 = vadd.f32 %v226_v29, %v187_v47 }
  0xeb   :  { %247 = vst [vmem:[%s425_s3 + $0x10] sm:$0xff] %v239_v48  ;;  %251 = vst [vmem:[%s425_s3 + $0x30] sm:$0xff] %v243_v49  ;;  %v240_v52 = vmax.f32 %v232_v50, 0.0  ;;  %v244_v53 = vmax.f32 %v236_v51, 0.0 }
  0xed   :  { %248 = vst [vmem:[%s425_s3 + $0x18] sm:$0xff] %v240_v52  ;;  %252 = vst [vmem:[%s425_s3 + $0x38] sm:$0xff] %v244_v53 }

// kernel: transformer_sentence_encoder_layer.5
= control target key start
LH: loop header
LB: loop body
LE: loop exit
PB: predicated region body
PF: predicated region fallthrough
CT: control target
= control target key end

     0   :  { %8 = vsyncpa [#allocation4], 0  ;;  %s522_s12 = smov [#allocation3]   ;;  %s602_s0 = inlined_call_operand.vmem [shape: f32[32,128], index: 0, kind: input, shape index: {}]   ;;  %s603_s1 = inlined_call_operand.hbm [shape: bf16[128,384], index: 1, kind: input, shape index: {}]   ;;  %s604_s2 = inlined_call_operand.vmem [shape: f32[1,384], index: 2, kind: input, shape index: {}]   ;;  %s605_s3 = inlined_call_operand.vmem [shape: f32[32,384], index: 3, kind: output, shape index: {}]  }
   0x1   :  { %s16_s13 = sshll.u32 %s522_s12, 4  ;;  %s17_s13 = int_to_ptr.vmem [resolvable:$true] %s16_s13 }
   0x2   :  { %s508_s14 = scalar_lea.vmem %s17_s13, 3072  ;;  %p513_p1 = scmp.lt.s32.totalorder %s17_s13, %s17_s13 }
   0x3   :  { %p509_p0 = scmp.ne.s32.totalorder %s17_s13, %s508_s14  ;;  %p514_p2 = scmp.lt.s32.totalorder %s508_s14, %s508_s14 }
   0x5   :  { %p515_p3 = por %p514_p2, %p513_p1 }
   0x7   :  { %p516_p4 = pnand %p515_p3, %p509_p0 }
   0x9   :  { %519 = shalt.err (!%p516_p4)
}
   0xa   :  { %s523_s15 = smov 192   ;;  %s524_s16 = smov 12  }
   0xb   :  { %22 = dma.hbm_to_vmem [thread:$0]  %s603_s1, 3072, %s17_s13, [#allocation4], %s523_s15, %s523_s15, %s524_s16  }
   0xc   :  { %520 = dma.done.wait [#allocation4], 3072  }
   0xd   :  { %521 = vsyncadd [#allocation4], 4294964224  ;;  %v525_v0 = vmov 0   ;;  %v468_v1 = vld [vmem:[#allocation3 + $0xac] ss:$12 sps:$4 sm:$0xff]   ;;  %v57_v18 = vld [vmem:[%s602_s0] sm:$0xff]  ;;  %v366_v31 = vlaneseq }
   0xe   :  { %255 = vmatprep.mubr.bf16.mxu0 %v525_v0  ;;  %v470_v2 = vld [vmem:[#allocation3 + $0xa8] ss:$12 sps:$4 sm:$0xff]   ;;  %223 = vmatprep.subr.bf16.mxu0 %v468_v1  ;;  %v471_v3 = vld [vmem:[#allocation3 + $0xb0] ss:$12 sps:$4 sm:$0xff]   ;;  %v475_v6 = vld [vmem:[#allocation3 + $0x98] ss:$12 sps:$4 sm:$0xff]  }
   0xf   :  { %224 = vmatpush1.bf16.msra.mxu0 %v470_v2  ;;  %v472_v4 = vld [vmem:[#allocation3 + $0x94] ss:$12 sps:$4 sm:$0xff]   ;;  %v474_v5 = vld [vmem:[#allocation3 + $0x90] ss:$12 sps:$4 sm:$0xff]   ;;  %444 = vmatprep.subr.bf16.mxu1 %v471_v3  ;;  %v478_v9 = vld [vmem:[#allocation3 + $0x78] ss:$12 sps:$4 sm:$0xff]  }
  0x10   :  { %445 = vmatpush3.bf16.msra.mxu1 %v471_v3  ;;  %225 = vmatprep.subr.bf16.mxu0 %v472_v4  ;;  %v476_v7 = vld [vmem:[#allocation3 + $0x7c] ss:$12 sps:$4 sm:$0xff]   ;;  %v479_v8 = vld [vmem:[#allocation3 + $0x80] ss:$12 sps:$4 sm:$0xff]   ;;  %v480_v10 = vld [vmem:[#allocation3 + $0x64] ss:$12 sps:$4 sm:$0xff]  }
  0x11   :  { %446 = vmatprep.subr.bf16.mxu1 %v475_v6  ;;  %v483_v11 = vld [vmem:[#allocation3 + $0x68] ss:$12 sps:$4 sm:$0xff]   ;;  %v482_v12 = vld [vmem:[#allocation3 + $0x60] ss:$12 sps:$4 sm:$0xff]   ;;  %v487_v14 = vld [vmem:[#allocation3 + $0x50] ss:$12 sps:$4 sm:$0xff]  }
  0x12   :  { %v484_v13 = vld [vmem:[#allocation3 + $0x4c] ss:$12 sps:$4 sm:$0xff]   ;;  %v486_v15 = vld [vmem:[#allocation3 + $0x48] ss:$12 sps:$4 sm:$0xff]   ;;  %v490_v19 = vld [vmem:[#allocation3 + $0x30] ss:$12 sps:$4 sm:$0xff]  }
  0x13   :  { %226 = vmatpush1.bf16.msra.mxu0 %v474_v5  ;;  %v488_v16 = vld [vmem:[#allocation3 + $0x34] ss:$12 sps:$4 sm:$0xff]   ;;  %v491_v17 = vld [vmem:[#allocation3 + $0x38] ss:$12 sps:$4 sm:$0xff]   ;;  %v58_v20 = vld [vmem:[%s602_s0 + $0x8] sm:$0xff]  ;;  %v367_v32 = vshrl.u32 %v366_v31, 7 }
  0x14   :  { %227 = vmatprep.subr.bf16.mxu0 %v476_v7  ;;  %447 = vmatpush3.bf16.msra.mxu1 %v475_v6  ;;  %v492_v21 = vld [vmem:[#allocation3 + $0x1c] ss:$12 sps:$4 sm:$0xff]   ;;  %v61_v22 = vpack.c.bf16 %v58_v20, %v57_v18  ;;  %v495_v23 = vld [vmem:[#allocation3 + $0x20] ss:$12 sps:$4 sm:$0xff]   ;;  %v494_v24 = vld [vmem:[#allocation3 + $0x18] ss:$12 sps:$4 sm:$0xff]  }
  0x15   :  { %448 = vmatprep.subr.bf16.mxu1 %v479_v8  ;;  %v496_v25 = vld [vmem:[#allocation3 + $0x4] ss:$12 sps:$4 sm:$0xff]   ;;  %v499_v26 = vld [vmem:[#allocation3 + $0x8] ss:$12 sps:$4 sm:$0xff]   ;;  %v498_v27 = vld [vmem:[#allocation3] ss:$12 sps:$4 sm:$0xff]  }
  0x16   :  { %460 = vmatprep.mubr.bf16.mxu1 %v61_v22  ;;  %v59_v28 = vld [vmem:[%s602_s0 + $0x10] sm:$0xff]  ;;  %v60_v29 = vld [vmem:[%s602_s0 + $0x18] sm:$0xff]  ;;  %v368_v33 = vsub.s32 0, %v367_v32  ;;  %v364_v34 = vld [vmem:[%s604_s2] sm:$0x7]  ;;  %v372_v35 = vsub.s32 1, %v367_v32 }
  0x17   :  { %228 = vmatpush1.bf16.msra.mxu0 %v478_v9  ;;  %v62_v30 = vpack.c.bf16 %v60_v29, %v59_v28  ;;  %v376_v36 = vsub.s32 2, %v367_v32 }
  0x18   :  { %229 = vmatprep.subr.bf16.mxu0 %v480_v10  ;;  %449 = vmatpush3.bf16.msra.mxu1 %v479_v8  ;;  %v369_v37 = vrot.slane %v364_v34, %v368_v33  ;;  %v373_v38 = vrot.slane %v364_v34, %v372_v35 }
  0x19   :  { %450 = vmatprep.subr.bf16.mxu1 %v483_v11  ;;  %v377_v39 = vrot.slane %v364_v34, %v376_v36 }
  0x1b   :  { %230 = vmatpush1.bf16.msra.mxu0 %v482_v12 }
  0x1c   :  { %231 = vmatprep.subr.bf16.mxu0 %v484_v13  ;;  %451 = vmatpush3.bf16.msra.mxu1 %v483_v11 }
  0x1d   :  { %452 = vmatprep.subr.bf16.mxu1 %v487_v14 }
  0x1f   :  { %232 = vmatpush1.bf16.msra.mxu0 %v486_v15 }
  0x20   :  { %233 = vmatprep.subr.bf16.mxu0 %v488_v16  ;;  %453 = vmatpush3.bf16.msra.mxu1 %v487_v14 }
  0x21   :  { %454 = vmatprep.subr.bf16.mxu1 %v491_v17 }
  0x23   :  { %234 = vmatpush1.bf16.msra.mxu0 %v490_v19 }
  0x24   :  { %235 = vmatprep.subr.bf16.mxu0 %v492_v21  ;;  %455 = vmatpush3.bf16.msra.mxu1 %v491_v17 }
  0x25   :  { %456 = vmatprep.subr.bf16.mxu1 %v495_v23 }
  0x27   :  { %236 = vmatpush1.bf16.msra.mxu0 %v494_v24 }
  0x28   :  { %237 = vmatprep.subr.bf16.mxu0 %v496_v25  ;;  %457 = vmatpush3.bf16.msra.mxu1 %v495_v23 }
  0x29   :  { %458 = vmatprep.subr.bf16.mxu1 %v499_v26 }
  0x2b   :  { %238 = vmatpush1.bf16.msra.mxu0 %v498_v27 }
  0x2c   :  { %459 = vmatpush3.bf16.msra.mxu1 %v499_v26 }
  0x2e   :  { %256 = vmatmul.mubr.bf16.vlgmr.msra.gmra.mxu0 %v61_v22 }
  0x2f   :  { %265 = vmatprep.mubr.bf16.mxu0 %v525_v0  ;;  %461 = vmatmul.mubr.bf16.vlgmr.msra.gmra.mxu1 %v62_v30 }
  0x36   :  { %266 = vmatmul.mubr.bf16.gmra.mxu0 %v62_v30 }
  0xee   :  { %v257_v40 = vpop.f32.mrf.mxu0 }
  0xef   :  { %v381_v41 = vadd.f32 %v369_v37, %v257_v40  ;;  %v462_v43 = vpop.f32.mrf.mxu1 }
  0xf0   :  { %v259_v42 = vpop.f32.mrf.mxu0  ;;  %v389_v45 = vadd.f32 %v462_v43, %v377_v39 }
  0xf1   :  { %393 = vst [vmem:[%s605_s3] sm:$0xff] %v381_v41  ;;  %v382_v44 = vadd.f32 %v373_v38, %v259_v42  ;;  %v310_v47 = vpop.f32.mrf.mxu1 }
  0xf2   :  { %v261_v46 = vpop.f32.mrf.mxu0  ;;  %401 = vst [vmem:[%s605_s3 + $0x40] sm:$0xff] %v389_v45  ;;  %v383_v49 = vadd.f32 %v377_v39, %v310_v47 }
  0xf3   :  { %394 = vst [vmem:[%s605_s3 + $0x8] sm:$0xff] %v382_v44  ;;  %v384_v48 = vadd.f32 %v369_v37, %v261_v46  ;;  %v463_v51 = vpop.f32.mrf.mxu1 }
  0xf4   :  { %v263_v50 = vpop.f32.mrf.mxu0  ;;  %395 = vst [vmem:[%s605_s3 + $0x10] sm:$0xff] %v383_v49  ;;  %v392_v53 = vadd.f32 %v463_v51, %v377_v39 }
  0xf5   :  { %396 = vst [vmem:[%s605_s3 + $0x18] sm:$0xff] %v384_v48  ;;  %v385_v52 = vadd.f32 %v373_v38, %v263_v50  ;;  %v313_v55 = vpop.f32.mrf.mxu1 }
  0xf6   :  { %v267_v54 = vpop.f32.mrf.mxu0  ;;  %404 = vst [vmem:[%s605_s3 + $0x58] sm:$0xff] %v392_v53  ;;  %v386_v57 = vadd.f32 %v377_v39, %v313_v55 }
  0xf7   :  { %397 = vst [vmem:[%s605_s3 + $0x20] sm:$0xff] %v385_v52  ;;  %v387_v56 = vadd.f32 %v369_v37, %v267_v54 }
  0xf8   :  { %v269_v58 = vpop.f32.mrf.mxu0  ;;  %398 = vst [vmem:[%s605_s3 + $0x28] sm:$0xff] %v386_v57 }
  0xf9   :  { %399 = vst [vmem:[%s605_s3 + $0x30] sm:$0xff] %v387_v56  ;;  %v388_v59 = vadd.f32 %v373_v38, %v269_v58 }
  0xfa   :  { %v271_v60 = vpop.f32.mrf.mxu0 }
  0xfb   :  { %400 = vst [vmem:[%s605_s3 + $0x38] sm:$0xff] %v388_v59  ;;  %v390_v61 = vadd.f32 %v369_v37, %v271_v60 }
  0xfc   :  { %v273_v62 = vpop.f32.mrf.mxu0 }
  0xfd   :  { %402 = vst [vmem:[%s605_s3 + $0x48] sm:$0xff] %v390_v61  ;;  %v391_v63 = vadd.f32 %v373_v38, %v273_v62 }
  0xff   :  { %403 = vst [vmem:[%s605_s3 + $0x50] sm:$0xff] %v391_v63 }
 0x100   :  { %409 = vsyncpa [#allocation4], 1 }

// kernel: transformer_sentence_encoder_layer.6
= control target key start
LH: loop header
LB: loop body
LE: loop exit
PB: predicated region body
PF: predicated region fallthrough
CT: control target
= control target key end

     0   :  { %s1590_s12 = smov 0   ;;  %s1592_s13 = smov 0   ;;  %s1960_s0 = inlined_call_operand.vmem [shape: f32[2,16,384], index: 0, kind: input, shape index: {}, may-alias: {0,1,2}]   ;;  %s1961_s1 = inlined_call_operand.vmem [shape: f32[2,16,384], index: 1, kind: input, shape index: {}, may-alias: {0,1,2}]   ;;  %s1962_s2 = inlined_call_operand.vmem [shape: f32[2,16,384], index: 2, kind: input, shape index: {}, may-alias: {0,1,2}]   ;;  %s1963_s3 = inlined_call_operand.vmem [shape: f32[2,16,128], index: 3, kind: output, shape index: {}]  }
   0x1   :  { %s1594_s14 = smov 0   ;;  %s1596_s15 = smov 0  }
   0x2   :  { %s1598_s16 = smov 0  }
   0x3 LB: > { %s32_s17 = sadd.s32 1, %s1557_s15  ;;  %p48_p1 = scmp.ne.s32.totalorder %s1549_s13, %s1545_s12  ;;  %s1561_s16 = sphi %s1598_s16, %s13_s16   ;;  %s1557_s15 = sphi %s1596_s15, %s1968_s15   ;;  %s1553_s14 = sphi %s1594_s14, %s1967_s14   ;;  %s1549_s13 = sphi %s1592_s13, %s1966_s13   ;;  %s1545_s12 = sphi %s1590_s12, %s1965_s12  }
   0x4   : > { %p34_p0 = scmp.ge.s32.totalorder %s32_s17, 2  ;;  %p49_p2 = scmp.eq.s32.totalorder %s1561_s16, 0 }
   0x5   : > { %s41_s20 = sadd.s32 1, %s1549_s13  ;;  %p1333_p5 = scmp.ge.s32.totalorder %s1561_s16, 2 }
   0x6   : > { %s1970_s17 = smov (%p34_p0, %s32_s17), 0  ;;  %p1621_p3 = por %p49_p2, %p48_p1 }
   0x7   : > { %s36_s19 = ssub.s32 %s1557_s15, %s1970_s17  ;;  %158 = sbr.rel (%p1333_p5) target bundleno = 30 (0x1e), region = 16 }
   0x8   : > { %p39_p4 = scmp.eq.s32.totalorder %s36_s19, 0 }
   0xa   : > { %s1629_s21 = scalar_select %p39_p4, %s1549_s13, %s41_s20  }
   0xc   : > { %161 = sbr.rel (!%p1621_p3) target bundleno = 18 (0x12), region = 20  ;;  %s163_s22 = sand.u32 (%p1621_p3), 1, %s1549_s13  }
   0xd   : > { %s1425_s23 = smul.u32 (%p1621_p3), 48, %s1557_s15  ;;  %s1334_s24 = sshll.u32 (%p1621_p3), %s163_s22, 4 }
   0xe   : > { %s165_s28 = scalar_lea.vmem (%p1621_p3), [#allocation5], %s1334_s24 }
   0xf   : > { %s171_s27 = scalar_lea.vmem (%p1621_p3), %s1960_s0, %s1425_s23 }
  0x10   : > { %v202_v0 = vld [vmem:[%s171_s27] sm:$0xff] (%p1621_p3)  ;;  %v204_v1 = vld [vmem:[%s171_s27 + $0x18] sm:$0xff] (%p1621_p3) }
  0x11   : > { %203 = vst [vmem:[%s165_s28] sm:$0xff] %v202_v0  ;;  %205 = vst [vmem:[%s165_s28 + $0x8] sm:$0xff] %v204_v1 }
  0x12 PF: > { %211 = sbr.rel (!%p1621_p3) target bundleno = 24 (0x18), region = 58  ;;  %s213_s29 = sand.u32 (%p1621_p3), 1, %s1549_s13  }
  0x13   : > { %s1337_s30 = smul.u32 (%p1621_p3), 48, %s1557_s15  ;;  %s1336_s4 = sshll.u32 (%p1621_p3), %s213_s29, 4 }
  0x14   : > { %s215_s8 = scalar_lea.vmem (%p1621_p3), [#allocation6], %s1336_s4 }
  0x15   : > { %s1236_s7 = scalar_lea.vmem (%p1621_p3), %s1961_s1, %s1337_s30 }
  0x16   : > { %v1338_v2 = vld [vmem:[%s1236_s7 + $0x8] sm:$0xff] (%p1621_p3)  ;;  %v1339_v3 = vld [vmem:[%s1236_s7 + $0x20] sm:$0xff] (%p1621_p3) }
  0x17   : > { %254 = vst [vmem:[%s215_s8] sm:$0xff] %v1338_v2  ;;  %256 = vst [vmem:[%s215_s8 + $0x8] sm:$0xff] %v1339_v3 }
  0x18 PF: > { %262 = sbr.rel (!%p1621_p3) target bundleno = 30 (0x1e), region = 96  ;;  %s264_s9 = sand.u32 (%p1621_p3), 1, %s1549_s13  }
  0x19   : > { %s1341_s10 = smul.u32 (%p1621_p3), 48, %s1557_s15  ;;  %s1340_s11 = sshll.u32 (%p1621_p3), %s264_s9, 4 }
  0x1a   : > { %s266_s23 = scalar_lea.vmem (%p1621_p3), [#allocation7], %s1340_s11 }
  0x1b   : > { %s1244_s22 = scalar_lea.vmem (%p1621_p3), %s1962_s2, %s1341_s10 }
  0x1c   : > { %v1342_v4 = vld [vmem:[%s1244_s22 + $0x10] sm:$0xff] (%p1621_p3)  ;;  %v1343_v5 = vld [vmem:[%s1244_s22 + $0x28] sm:$0xff] (%p1621_p3) }
  0x1d   : > { %305 = vst [vmem:[%s266_s23] sm:$0xff] %v1342_v4  ;;  %307 = vst [vmem:[%s266_s23 + $0x8] sm:$0xff] %v1343_v5 }
  0x1e PF: > { %p1344_p6 = scmp.ge.s32.totalorder %s1561_s16, 1  ;;  %p312_p7 = scmp.lt.s32.totalorder %s1561_s16, 3 }
  0x20   : > { %p313_p8 = pnand %p1344_p6, %p312_p7 }
  0x21   : > { %s319_s18 = sand.u32 (!%p313_p8), 1, %s1545_s12   ;;  %s1567_s26 = smov (!%p313_p8), 96  }
  0x22   : > { %316 = sbr.rel (%p313_p8) target bundleno = 1418 (0x58a), region = 134  ;;  %s1659_s24 = sshll.u32 (!%p313_p8), %s319_s18, 4 }
  0x23   : > { %s328_s12 = scalar_lea.vmem (!%p313_p8), [#allocation6], %s1659_s24  ;;  %s321_s25 = scalar_lea.vmem (!%p313_p8), [#allocation5], %s1659_s24 }
  0x24   : > { %s335_s27 = scalar_lea.vmem (!%p313_p8), [#allocation7], %s1659_s24  ;;  %s1568_s28 = smov (!%p313_p8), 64  }
  0x25   : > { %s1569_s29 = smov (!%p313_p8), 32   ;;  %p372_p9 = scmp.lt.s32.totalorder (!%p313_p8), %s1553_s14, 1 }
  0x27   : > { %v1563_v6 = vmov 0.0   ;;  %vm1564_vm0 = vmmov 0   ;;  %v408_v7 = vld [vmem:[%s328_s12] sm:$0xff]  ;;  %v409_v8 = vld [vmem:[%s328_s12 + $0x8] sm:$0xff]  ;;  %vm414_vm1 = vcmask 261120   ;;  %vm386_vm2 = vcmask 7168  }
  0x28   : > { %1377 = vmatprep.subr.bf16.mxu0 %v1563_v6  ;;  %403 = vst [vmem:[#allocation4] sm:$0xff] %v1563_v6  ;;  %404 = vst [vmem:[#allocation4 + $0x8] sm:$0xff] %v1563_v6  ;;  %1379 = vmatprep.mubr.msk.bf16.mxu0 %vm1564_vm0, %v1563_v6  ;;  %v1667_v9 = vpack.c.bf16 %v409_v8, %v408_v7  ;;  %v405_v11 = vld [vmem:[%s321_s25] sm:$0xff]  ;;  %v406_v12 = vld [vmem:[%s321_s25 + $0x8] sm:$0xff]  ;;  %v1565_v14 = vmov -inf   ;;  %vm464_vm3 = vcmask 130048  }
  0x29   : > { %1383 = vmatprep.subr.bf16.mxu1 %v1563_v6  ;;  %1385 = vmatprep.mubr.msk.bf16.mxu1 %vm1564_vm0, %v1563_v6  ;;  %v407_v13 = vpack.c.bf16 %v406_v12, %v405_v11  ;;  %387 = vst.msk [vmem:[#allocation2] sm:$0xff] %vm386_vm2, %v1565_v14  ;;  %388 = vst.msk [vmem:[#allocation2 + $0x8] sm:$0xff] %vm386_vm2, %v1565_v14  ;;  %v1566_v21 = vmov 0   ;;  %v411_v30 = vld [vmem:[%s335_s27] sm:$0xff]  ;;  %v412_v31 = vld [vmem:[%s335_s27 + $0x8] sm:$0xff]  ;;  %vm749_vm4 = vcmask 523520  }
  0x2a   : > { %v419_v10 = vsel %vm414_vm1, %v1667_v9, 0  ;;  %389 = vst.msk [vmem:[#allocation2 + $0x10] sm:$0xff] %vm386_vm2, %v1565_v14  ;;  %390 = vst.msk [vmem:[#allocation2 + $0x18] sm:$0xff] %vm386_vm2, %v1565_v14  ;;  %1473 = vset.pattern.permute.xlu1 %v1566_v21  ;;  %1474 = vset.pattern.permute.xlu0 %v1566_v21  ;;  %v1725_v32 = vpack.c.bf16 %v412_v31, %v411_v30  ;;  %vm925_vm5 = vcmask 785920   ;;  %vm1101_vm6 = vcmask 1048320   ;;  %s1972_s14 = smov (!%p372_p9, %s1553_s14), 1 }
  0x2b   : > { %1378 = vmatpush3.bf16.xpose.msra.mxu0 %v419_v10  ;;  %391 = vst.msk [vmem:[#allocation2 + $0x20] sm:$0xff] %vm386_vm2, %v1565_v14  ;;  %392 = vst.msk [vmem:[#allocation2 + $0x28] sm:$0xff] %vm386_vm2, %v1565_v14  ;;  %s1360_s30 = sshll.u32 %s1972_s14, 4 }
  0x2c   : > { %1395 = vmatprep.subr.bf16.mxu0 %v1563_v6  ;;  %393 = vst.msk [vmem:[#allocation2 + $0x30] sm:$0xff] %vm386_vm2, %v1565_v14  ;;  %394 = vst.msk [vmem:[#allocation2 + $0x38] sm:$0xff] %vm386_vm2, %v1565_v14  ;;  %1384 = vmatpush3.bf16.msra.mxu1 %v1725_v32  ;;  %s379_s6 = scalar_lea.vmem %s1963_s3, %s1360_s30 }
  0x2d   : > { %395 = vst.msk [vmem:[#allocation3] sm:$0xff] %vm386_vm2, %v1563_v6  ;;  %396 = vst.msk [vmem:[#allocation3 + $0x8] sm:$0xff] %vm386_vm2, %v1563_v6  ;;  %1389 = vmatprep.subr.bf16.mxu1 %v1563_v6 }
  0x2e   : > { %397 = vst.msk [vmem:[#allocation3 + $0x10] sm:$0xff] %vm386_vm2, %v1563_v6  ;;  %398 = vst.msk [vmem:[#allocation3 + $0x18] sm:$0xff] %vm386_vm2, %v1563_v6 }
  0x2f   : > { %399 = vst.msk [vmem:[#allocation3 + $0x20] sm:$0xff] %vm386_vm2, %v1563_v6  ;;  %400 = vst.msk [vmem:[#allocation3 + $0x28] sm:$0xff] %vm386_vm2, %v1563_v6 }
  0x30   : > { %401 = vst.msk [vmem:[#allocation3 + $0x30] sm:$0xff] %vm386_vm2, %v1563_v6  ;;  %402 = vst.msk [vmem:[#allocation3 + $0x38] sm:$0xff] %vm386_vm2, %v1563_v6  ;;  %v1704_v22 = vld [vmem:[#allocation2] sm:$0xff]  ;;  %v1709_v25 = vld [vmem:[#allocation2 + $0x8] sm:$0xff] }
  0x31   : > { %v1785_v10 = vld [vmem:[#allocation2 + $0x10] sm:$0xff] }
  0x32   : > { %1380 = vmatmul.mubr.msk.bf16.vlgmr.msra.gmra.mxu0 %vm414_vm1, %v407_v13  ;;  %v1812_v21 = vld [vmem:[#allocation2 + $0x28] sm:$0xff] }
  0x33   : > { %1397 = vmatprep.mubr.msk.bf16.mxu0 %vm1564_vm0, %v1563_v6  ;;  %v1822_v31 = vld [vmem:[#allocation2 + $0x30] sm:$0xff] }
  0xf2   : > { %v455_v15 = vpop.f32.mrf.mxu0 }
  0xf3   : > { %v465_v16 = vsel %vm464_vm3, %v455_v15, -inf }
  0xf4   : > { %466 = vmax.xlane.f32.xlu0 %v465_v16  ;;  %v1381_v17 = vpop.f32.mrf.mxu0 }
  0xf5   : > { %v1800_v17 = vld [vmem:[#allocation2 + $0x20] sm:$0xff] }
  0xf6   : > { %v458_v18 = vpop.f32.mrf.mxu0 }
  0xf7   : > { %v468_v19 = vsel %vm464_vm3, %v458_v18, -inf }
  0xf8   : > { %469 = vmax.xlane.f32.xlu0 %v468_v19  ;;  %v1382_v20 = vpop.f32.mrf.mxu0 }
 0x10e   : > { %579 = vrot.lane.b32.xlu0 %v1667_v9, %s1567_s26 }
 0x17d   : > { %v467_v23 = vpop.xlane.xlu0 %466 }
 0x17e   : > { %v1707_v24 = vmax.f32 %v1704_v22, %v467_v23 }
 0x180   : > { %v473_v26 = vsub.f32 %v1704_v22, %v1707_v24  ;;  %573 = vst.msk [vmem:[#allocation2] sm:$0xff] %vm386_vm2, %v1707_v24  ;;  %481 = vperm.xlu1 %1473, %v1707_v24  }
 0x181   : > { %v470_v27 = vpop.xlane.xlu0 %469 }
 0x182   : > { %v1717_v28 = vmax.f32 %v1709_v25, %v470_v27 }
 0x184   : > { %v474_v29 = vsub.f32 %v1709_v25, %v1717_v28  ;;  %574 = vst.msk [vmem:[#allocation2 + $0x8] sm:$0xff] %vm386_vm2, %v1717_v28  ;;  %486 = vperm.xlu1 %1473, %v1717_v28  }
 0x185   : > { %v580_v39 = vpop.permute.xlu0 %579 }
 0x186   : > { %v585_v43 = vsel %vm414_vm1, %v580_v39, 0 }
 0x188   : > { %576 = vrot.lane.b32.xlu1 %v407_v13, %s1567_s26 }
 0x18c   : > { %756 = vrot.lane.b32.xlu1 %v1667_v9, %s1568_s28 }
 0x190   : > { %754 = vrot.lane.b32.xlu1 %v407_v13, %s1568_s28 }
 0x194   : > { %932 = vrot.lane.b32.xlu1 %v1667_v9, %s1569_s29 }
 0x198   : > { %930 = vrot.lane.b32.xlu1 %v407_v13, %s1569_s29  ;;  %v1790_v13 = vld [vmem:[#allocation2 + $0x18] sm:$0xff] }
 0x1fb   : > { %v482_v33 = vpop.permute.xlu1 %481 }
 0x1fc   : > { %v489_v34 = vsub.f32 %v455_v15, %v482_v33 }
 0x1fe   : > { %v491_v35 = vmul.f32 1.442695, %v489_v34 }
 0x1ff   : > { %v487_v36 = vpop.permute.xlu1 %486 }
 0x200   : > { %v490_v37 = vsub.f32 %v458_v18, %v487_v36  ;;  %1475 = vpow2.f32 %v491_v35  ;;  %v1832_v36 = vld [vmem:[#allocation2 + $0x38] sm:$0xff] }
 0x202   : > { %v493_v38 = vmul.f32 1.442695, %v490_v37 }
 0x203   : > { %v577_v40 = vpop.permute.xlu1 %576 }
 0x204   : > { %1477 = vpow2.f32 %v493_v38 }
 0x207   : > { %v757_v45 = vpop.permute.xlu1 %756 }
 0x208   : > { %v762_v47 = vsel %vm414_vm1, %v757_v45, 0 }
 0x20b   : > { %v755_v46 = vpop.permute.xlu1 %754 }
 0x20d   : > { %v1736_v41 = vpop.eup %1475 }
 0x20f   : > { %v933_v48 = vpop.permute.xlu1 %932 }
 0x210   : > { %v938_v49 = vsel %vm414_vm1, %v933_v48, 0 }
 0x211   : > { %v1738_v42 = vpop.eup %1477 }
 0x212   : > { %v510_v44 = vpack.c.bf16 %v1738_v42, %v1736_v41 }
 0x213   : > { %v931_v50 = vpop.permute.xlu1 %930 }
 0x214   : > { %1386 = vmatmul.mubr.msk.bf16.vlgmr.msra.gmra.mxu1 %vm464_vm3, %v510_v44  ;;  %v475_v44 = vmul.f32 1.442695, %v473_v26 }
 0x215   : > { %1390 = vmatpush3.bf16.xpose.msra.mxu1 %v585_v43  ;;  %1391 = vmatprep.mubr.msk.bf16.mxu1 %vm1564_vm0, %v1563_v6  ;;  %v502_v43 = vsel %vm464_vm3, %v1738_v42, 0.0 }
 0x216   : > { %1401 = vmatprep.subr.bf16.mxu1 %v1563_v6  ;;  %1479 = vpow2.f32 %v475_v44 }
 0x21c   : > { %1392 = vmatmul.mubr.msk.bf16.vlgmr.msra.gmra.mxu1 %vm414_vm1, %v577_v40 }
 0x21d   : > { %1402 = vmatpush3.bf16.xpose.msra.mxu1 %v762_v47  ;;  %1403 = vmatprep.mubr.msk.bf16.mxu1 %vm1564_vm0, %v1563_v6 }
 0x21e   : > { %1413 = vmatprep.subr.bf16.mxu1 %v1563_v6 }
 0x223   : > { %v1856_v45 = vpop.eup %1479 }
 0x224   : > { %1404 = vmatmul.mubr.msk.bf16.vlgmr.msra.gmra.mxu1 %vm414_vm1, %v755_v46  ;;  %v477_v46 = vmul.f32 1.442695, %v474_v29 }
 0x225   : > { %1414 = vmatpush3.bf16.xpose.msra.mxu1 %v938_v49  ;;  %1415 = vmatprep.mubr.msk.bf16.mxu1 %vm1564_vm0, %v1563_v6 }
 0x226   : > { %1481 = vpow2.f32 %v477_v46 }
 0x22c   : > { %1416 = vmatmul.mubr.msk.bf16.vlgmr.msra.gmra.mxu1 %vm414_vm1, %v931_v50 }
 0x233   : > { %v1864_v42 = vpop.eup %1481 }
 0x2d4   : > { %v1757_v51 = vpop.f32.mrf.mxu1 }
 0x2d6   : > { %v1387_v52 = vpop.f32.mrf.mxu1 }
 0x2d8   : > { %v1759_v53 = vpop.f32.mrf.mxu1 }
 0x2da   : > { %v1388_v54 = vpop.f32.mrf.mxu1 }
 0x2dc   : > { %v1761_v55 = vpop.f32.mrf.mxu1 }
 0x2dd   : > { %v631_v56 = vsel %vm464_vm3, %v1761_v55, -inf }
 0x2de   : > { %632 = vmax.xlane.f32.xlu1 %v631_v56  ;;  %v1393_v57 = vpop.f32.mrf.mxu1 }
 0x2e0   : > { %v1765_v58 = vpop.f32.mrf.mxu1 }
 0x2e1   : > { %v634_v59 = vsel %vm464_vm3, %v1765_v58, -inf }
 0x2e2   : > { %635 = vmax.xlane.f32.xlu0 %v634_v59  ;;  %v1394_v60 = vpop.f32.mrf.mxu1 }
 0x2e4   : > { %v1769_v61 = vpop.f32.mrf.mxu1 }
 0x2e5   : > { %v808_v62 = vsel %vm464_vm3, %v1769_v61, -inf }
 0x2e6   : > { %809 = vmax.xlane.f32.xlu0 %v808_v62  ;;  %v1405_v63 = vpop.f32.mrf.mxu1 }
 0x2e8   : > { %v1773_v0 = vpop.f32.mrf.mxu1 }
 0x2e9   : > { %v811_v1 = vsel %vm464_vm3, %v1773_v0, -inf }
 0x2ea   : > { %812 = vmax.xlane.f32.xlu1 %v811_v1  ;;  %v1406_v2 = vpop.f32.mrf.mxu1 }
 0x2ec   : > { %v1777_v3 = vpop.f32.mrf.mxu1 }
 0x2ed   : > { %v984_v4 = vsel %vm464_vm3, %v1777_v3, -inf }
 0x2ee   : > { %v1417_v5 = vpop.f32.mrf.mxu1  ;;  %985 = vmax.xlane.f32.xlu0 %v984_v4 }
 0x2f0   : > { %v1781_v7 = vpop.f32.mrf.mxu1 }
 0x2f1   : > { %v987_v8 = vsel %vm464_vm3, %v1781_v7, -inf }
 0x2f2   : > { %v1418_v9 = vpop.f32.mrf.mxu1  ;;  %988 = vmax.xlane.f32.xlu1 %v987_v8 }
 0x367   : > { %v633_v11 = vpop.xlane.xlu1 %632 }
 0x368   : > { %v1788_v12 = vmax.f32 %v1785_v10, %v633_v11 }
 0x36a   : > { %v639_v14 = vsub.f32 %v1785_v10, %v1788_v12  ;;  %752 = vst.msk [vmem:[#allocation2 + $0x10] sm:$0xff] %vm386_vm2, %v1788_v12  ;;  %647 = vperm.xlu0 %1474, %v1788_v12  }
 0x36b   : > { %v636_v15 = vpop.xlane.xlu0 %635 }
 0x36c   : > { %v1798_v16 = vmax.f32 %v1790_v13, %v636_v15 }
 0x36e   : > { %v640_v18 = vsub.f32 %v1790_v13, %v1798_v16  ;;  %753 = vst.msk [vmem:[#allocation2 + $0x18] sm:$0xff] %vm386_vm2, %v1798_v16  ;;  %1030 = vrot.lane.b32.xlu0 %v1725_v32, %s1569_s29  ;;  %652 = vperm.xlu1 %1473, %v1798_v16  }
 0x36f   : > { %v810_v19 = vpop.xlane.xlu0 %809 }
 0x370   : > { %v1810_v20 = vmax.f32 %v1800_v17, %v810_v19  ;;  %v643_v15 = vmul.f32 1.442695, %v640_v18  ;;  %v495_v18 = vld [vmem:[#allocation3] sm:$0xff] }
 0x372   : > { %v816_v23 = vsub.f32 %v1800_v17, %v1810_v20  ;;  %928 = vst.msk [vmem:[#allocation2 + $0x20] sm:$0xff] %vm386_vm2, %v1810_v20  ;;  %824 = vperm.xlu1 %1473, %v1810_v20  }
 0x373   : > { %v813_v27 = vpop.xlane.xlu1 %812 }
 0x374   : > { %v1820_v30 = vmax.f32 %v1812_v21, %v813_v27 }
 0x376   : > { %v817_v33 = vsub.f32 %v1812_v21, %v1820_v30  ;;  %929 = vst.msk [vmem:[#allocation2 + $0x28] sm:$0xff] %vm386_vm2, %v1820_v30  ;;  %829 = vperm.xlu1 %1473, %v1820_v30   ;;  %v839_v30 = vld [vmem:[#allocation3 + $0x20] sm:$0xff] }
 0x377   : > { %v986_v34 = vpop.xlane.xlu0 %985 }
 0x378   : > { %v1830_v35 = vmax.f32 %v1822_v31, %v986_v34 }
 0x37a   : > { %678 = vrot.lane.b32.xlu1 %v1725_v32, %s1567_s26  ;;  %v992_v37 = vsub.f32 %v1822_v31, %v1830_v35  ;;  %1104 = vst.msk [vmem:[#allocation2 + $0x30] sm:$0xff] %vm386_vm2, %v1830_v35 }
 0x37b   : > { %v989_v38 = vpop.xlane.xlu1 %988 }
 0x37c   : > { %v1841_v39 = vmax.f32 %v1832_v36, %v989_v38  ;;  %v496_v38 = vld [vmem:[#allocation3 + $0x8] sm:$0xff] }
 0x37e   : > { %1000 = vperm.xlu1 %1473, %v1830_v35   ;;  %v993_v40 = vsub.f32 %v1832_v36, %v1841_v39  ;;  %1105 = vst.msk [vmem:[#allocation2 + $0x38] sm:$0xff] %vm386_vm2, %v1841_v39 }
 0x380   : > { %v996_v17 = vmul.f32 1.442695, %v993_v40 }
 0x382   : > { %1005 = vperm.xlu1 %1473, %v1841_v39  }
 0x386   : > { %854 = vrot.lane.b32.xlu1 %v1725_v32, %s1568_s28  ;;  %v499_v32 = vsel %vm464_vm3, %v1736_v41, 0.0 }
 0x38d   : > { %503 = vadd.xlane.f32.xlu0 %v502_v43 }
 0x3a3   : > { %559 = vperm.xlu0 %1474, %v1856_v45  }
 0x3aa   : > { %500 = vadd.xlane.f32.xlu1 %v499_v32 }
 0x3bb   : > { %564 = vperm.xlu1 %1473, %v1864_v42  }
 0x3e5   : > { %v648_v22 = vpop.permute.xlu0 %647 }
 0x3e6   : > { %v655_v24 = vsub.f32 %v1761_v55, %v648_v22  ;;  %v497_v22 = vmul.f32 %v1856_v45, %v495_v18  ;;  %v662_v45 = vld [vmem:[#allocation3 + $0x10] sm:$0xff] }
 0x3e8   : > { %v657_v26 = vmul.f32 1.442695, %v655_v24 }
 0x3e9   : > { %v653_v47 = vpop.permute.xlu1 %652  ;;  %v1031_v11 = vpop.permute.xlu0 %1030 }
 0x3ea   : > { %1483 = vpow2.f32 %v657_v26  ;;  %v656_v48 = vsub.f32 %v1765_v58, %v653_v47 }
 0x3ec   : > { %v659_v49 = vmul.f32 1.442695, %v656_v48 }
 0x3ed   : > { %v825_v25 = vpop.permute.xlu1 %824 }
 0x3ee   : > { %1485 = vpow2.f32 %v659_v49  ;;  %v832_v28 = vsub.f32 %v1769_v61, %v825_v25  ;;  %v820_v49 = vmul.f32 1.442695, %v817_v33  ;;  %v994_v25 = vmul.f32 1.442695, %v992_v37 }
 0x3f0   : > { %v834_v29 = vmul.f32 1.442695, %v832_v28 }
 0x3f1   : > { %v830_v41 = vpop.permute.xlu1 %829 }
 0x3f2   : > { %1487 = vpow2.f32 %v834_v29  ;;  %v833_v50 = vsub.f32 %v1773_v0, %v830_v41 }
 0x3f4   : > { %v836_v52 = vmul.f32 1.442695, %v833_v50  ;;  %v840_v50 = vld [vmem:[#allocation3 + $0x28] sm:$0xff] }
 0x3f5   : > { %v679_v54 = vpop.permute.xlu1 %678 }
 0x3f6   : > { %1489 = vpow2.f32 %v836_v52  ;;  %1396 = vmatpush3.bf16.msra.mxu0 %v679_v54 }
 0x3f7   : > { %v1484_v55 = vpop.eup %1483  ;;  %1407 = vmatprep.subr.bf16.mxu0 %v1563_v6 }
 0x3f8   : > { %v666_v56 = vsel %vm464_vm3, %v1484_v55, 0.0 }
 0x3f9   : > { %667 = vadd.xlane.f32.xlu1 %v666_v56  ;;  %v1001_v57 = vpop.permute.xlu1 %1000 }
 0x3fa   : > { %v1008_v58 = vsub.f32 %v1777_v3, %v1001_v57  ;;  %v641_v3 = vmul.f32 1.442695, %v639_v14 }
 0x3fb   : > { %v1486_v59 = vpop.eup %1485 }
 0x3fc   : > { %v1010_v60 = vmul.f32 1.442695, %v1008_v58  ;;  %v669_v61 = vsel %vm464_vm3, %v1486_v59, 0.0  ;;  %v676_v62 = vpack.c.bf16 %v1486_v59, %v1484_v55  ;;  %v1015_v55 = vld [vmem:[#allocation3 + $0x30] sm:$0xff]  ;;  %v1016_v59 = vld [vmem:[#allocation3 + $0x38] sm:$0xff] }
 0x3fd   : > { %670 = vadd.xlane.f32.xlu0 %v669_v61  ;;  %v1006_v63 = vpop.permute.xlu1 %1005 }
 0x3fe   : > { %1491 = vpow2.f32 %v1010_v60  ;;  %v1009_v0 = vsub.f32 %v1781_v7, %v1006_v63  ;;  %1398 = vmatmul.mubr.msk.bf16.vlgmr.msra.gmra.mxu0 %vm464_vm3, %v676_v62 }
 0x3ff   : > { %v1488_v1 = vpop.eup %1487  ;;  %1409 = vmatprep.mubr.msk.bf16.mxu0 %vm1564_vm0, %v1563_v6 }
 0x400   : > { %v1012_v2 = vmul.f32 1.442695, %v1009_v0  ;;  %v843_v4 = vsel %vm464_vm3, %v1488_v1, 0.0 }
 0x401   : > { %844 = vadd.xlane.f32.xlu1 %v843_v4  ;;  %v855_v5 = vpop.permute.xlu1 %854 }
 0x402   : > { %1493 = vpow2.f32 %v1012_v2  ;;  %1408 = vmatpush3.bf16.msra.mxu0 %v855_v5 }
 0x403   : > { %v1490_v8 = vpop.eup %1489  ;;  %1419 = vmatprep.subr.bf16.mxu0 %v1563_v6  ;;  %1495 = vpow2.f32 %v641_v3 }
 0x404   : > { %v846_v7 = vsel %vm464_vm3, %v1490_v8, 0.0  ;;  %v853_v9 = vpack.c.bf16 %v1490_v8, %v1488_v1  ;;  %1497 = vpow2.f32 %v643_v15 }
 0x405   : > { %847 = vadd.xlane.f32.xlu1 %v846_v7 }
 0x406   : > { %1410 = vmatmul.mubr.msk.bf16.vlgmr.msra.gmra.mxu0 %vm464_vm3, %v853_v9 }
 0x407   : > { %1420 = vmatpush3.bf16.msra.mxu0 %v1031_v11  ;;  %1421 = vmatprep.mubr.msk.bf16.mxu0 %vm1564_vm0, %v1563_v6  ;;  %v498_v6 = vmul.f32 %v1864_v42, %v496_v38 }
 0x40b   : > { %v1492_v10 = vpop.eup %1491 }
 0x40c   : > { %v1019_v12 = vsel %vm464_vm3, %v1492_v10, 0.0 }
 0x40d   : > { %1020 = vadd.xlane.f32.xlu1 %v1019_v12 }
 0x40f   : > { %v1494_v14 = vpop.eup %1493 }
 0x410   : > { %v1022_v19 = vsel %vm464_vm3, %v1494_v14, 0.0  ;;  %v1029_v27 = vpack.c.bf16 %v1494_v14, %v1492_v10  ;;  %v1496_v34 = vpop.eup %1495 }
 0x411   : > { %1023 = vadd.xlane.f32.xlu1 %v1022_v19  ;;  %v1498_v13 = vpop.eup %1497  ;;  %v664_v28 = vmul.f32 %v1496_v34, %v662_v45 }
 0x412   : > { %1422 = vmatmul.mubr.msk.bf16.vlgmr.msra.gmra.mxu0 %vm464_vm3, %v1029_v27 }
 0x413   : > { %729 = vperm.xlu0 %1474, %v1496_v34  }
 0x416   : > { %v504_v43 = vpop.xlane.xlu0 %503 }
 0x417   : > { %v506_v44 = vadd.f32 %v504_v43, %v498_v6 }
 0x419   : > { %509 = vst.msk [vmem:[#allocation3 + $0x8] sm:$0xff] %vm386_vm2, %v506_v44 }
 0x41e   : > { %v560_v46 = vpop.permute.xlu0 %559 }
 0x41f   : > { %v567_v32 = vmul.f32 0.0, %v560_v46 }
 0x420   : > { %v1110_v7 = vld [vmem:[#allocation3 + $0x8] sm:$0xff] }
 0x421   : > { %v569_v16 = vadd.f32 %v567_v32, %v1757_v51  ;;  %v818_v51 = vmul.f32 1.442695, %v816_v23 }
 0x422   : > { %734 = vperm.xlu1 %1473, %v1498_v13  }
 0x423   : > { %571 = vst.msk [vmem:[#allocation4] sm:$0xff] %vm414_vm1, %v569_v16  ;;  %1499 = vpow2.f32 %v818_v51 }
 0x424   : > { %1501 = vpow2.f32 %v820_v49 }
 0x425   : > { %1503 = vpow2.f32 %v994_v25 }
 0x426   : > { %1505 = vpow2.f32 %v996_v17 }
 0x430   : > { %v1500_v21 = vpop.eup %1499 }
 0x431   : > { %v841_v31 = vmul.f32 %v1500_v21, %v839_v30  ;;  %v1502_v35 = vpop.eup %1501 }
 0x432   : > { %v842_v54 = vmul.f32 %v1502_v35, %v840_v50  ;;  %v1504_v40 = vpop.eup %1503 }
 0x433   : > { %v501_v24 = vpop.xlane.xlu1 %500  ;;  %v1017_v56 = vmul.f32 %v1504_v40, %v1015_v55  ;;  %v1506_v57 = vpop.eup %1505 }
 0x434   : > { %v505_v26 = vadd.f32 %v501_v24, %v497_v22  ;;  %v1018_v61 = vmul.f32 %v1506_v57, %v1016_v59 }
 0x436   : > { %508 = vst.msk [vmem:[#allocation3] sm:$0xff] %vm386_vm2, %v505_v26 }
 0x437   : > { %v565_v42 = vpop.permute.xlu1 %564 }
 0x438   : > { %v568_v47 = vmul.f32 0.0, %v565_v42  ;;  %v725_v42 = vld [vmem:[#allocation4] sm:$0xff] }
 0x43a   : > { %v570_v48 = vadd.f32 %v568_v47, %v1759_v53  ;;  %v663_v53 = vld [vmem:[#allocation3 + $0x18] sm:$0xff] }
 0x43b   : > { %v665_v20 = vmul.f32 %v1498_v13, %v663_v53 }
 0x43c   : > { %572 = vst.msk [vmem:[#allocation4 + $0x8] sm:$0xff] %vm414_vm1, %v570_v48 }
 0x43d   : > { %v1109_v5 = vld [vmem:[#allocation3] sm:$0xff] }
 0x43e   : > { %1507 = vrcp.f32 %v1109_v5 }
 0x43f   : > { %1509 = vrcp.f32 %v1110_v7 }
 0x443   : > { %v726_v45 = vld [vmem:[#allocation4 + $0x8] sm:$0xff] }
 0x44b   : > { %v1508_v38 = vpop.eup %1507 }
 0x44c   : > { %v1510_v46 = vpop.eup %1509 }
 0x482   : > { %v668_v29 = vpop.xlane.xlu1 %667 }
 0x483   : > { %v672_v41 = vadd.f32 %v668_v29, %v664_v28 }
 0x485   : > { %674 = vst.msk [vmem:[#allocation3 + $0x10] sm:$0xff] %vm386_vm2, %v672_v41 }
 0x486   : > { %v671_v23 = vpop.xlane.xlu0 %670 }
 0x487   : > { %v673_v33 = vadd.f32 %v671_v23, %v665_v20 }
 0x489   : > { %675 = vst.msk [vmem:[#allocation3 + $0x18] sm:$0xff] %vm386_vm2, %v673_v33 }
 0x48a   : > { %v845_v37 = vpop.xlane.xlu1 %844 }
 0x48b   : > { %v849_v52 = vadd.f32 %v845_v37, %v841_v31 }
 0x48c   : > { %v1129_v11 = vld [vmem:[#allocation3 + $0x10] sm:$0xff] }
 0x48d   : > { %851 = vst.msk [vmem:[#allocation3 + $0x20] sm:$0xff] %vm386_vm2, %v849_v52  ;;  %1511 = vrcp.f32 %v1129_v11 }
 0x48e   : > { %v848_v36 = vpop.xlane.xlu1 %847  ;;  %v730_v26 = vpop.permute.xlu0 %729 }
 0x48f   : > { %v850_v39 = vadd.f32 %v848_v36, %v842_v54  ;;  %v737_v47 = vmul.f32 %v730_v26, %v725_v42 }
 0x490   : > { %v1130_v12 = vld [vmem:[#allocation3 + $0x18] sm:$0xff] }
 0x491   : > { %852 = vst.msk [vmem:[#allocation3 + $0x28] sm:$0xff] %vm386_vm2, %v850_v39  ;;  %1513 = vrcp.f32 %v1130_v12 }
 0x494   : > { %v1149_v14 = vld [vmem:[#allocation3 + $0x20] sm:$0xff] }
 0x495   : > { %1515 = vrcp.f32 %v1149_v14 }
 0x496   : > { %v1021_v58 = vpop.xlane.xlu1 %1020 }
 0x497   : > { %v1025_v60 = vadd.f32 %v1021_v58, %v1017_v56 }
 0x498   : > { %v1150_v15 = vld [vmem:[#allocation3 + $0x28] sm:$0xff] }
 0x499   : > { %1027 = vst.msk [vmem:[#allocation3 + $0x30] sm:$0xff] %vm386_vm2, %v1025_v60  ;;  %1517 = vrcp.f32 %v1150_v15 }
 0x49a   : > { %v1024_v62 = vpop.xlane.xlu1 %1023  ;;  %v1512_v32 = vpop.eup %1511 }
 0x49b   : > { %v1026_v63 = vadd.f32 %v1024_v62, %v1018_v61 }
 0x49d   : > { %1028 = vst.msk [vmem:[#allocation3 + $0x38] sm:$0xff] %vm386_vm2, %v1026_v63 }
 0x49e   : > { %v1514_v13 = vpop.eup %1513  ;;  %v735_v48 = vpop.permute.xlu1 %734 }
 0x49f   : > { %v738_v25 = vmul.f32 %v735_v48, %v726_v45 }
 0x4a0   : > { %v1169_v27 = vld [vmem:[#allocation3 + $0x30] sm:$0xff] }
 0x4a1   : > { %1519 = vrcp.f32 %v1169_v27 }
 0x4a2   : > { %v1516_v16 = vpop.eup %1515 }
 0x4a4   : > { %v1170_v43 = vld [vmem:[#allocation3 + $0x38] sm:$0xff] }
 0x4a5   : > { %1521 = vrcp.f32 %v1170_v43 }
 0x4a6   : > { %v1518_v18 = vpop.eup %1517 }
 0x4ae   : > { %v1520_v22 = vpop.eup %1519 }
 0x4b2   : > { %v1522_v24 = vpop.eup %1521 }
 0x4be   : > { %v718_v0 = vpop.f32.mrf.mxu0 }
 0x4bf   : > { %741 = vrot.lane.b32.xlu0 %v718_v0, %s1569_s29 }
 0x4c0   : > { %v1399_v1 = vpop.f32.mrf.mxu0 }
 0x4c2   : > { %v721_v2 = vpop.f32.mrf.mxu0 }
 0x4c3   : > { %743 = vrot.lane.b32.xlu0 %v721_v2, %s1569_s29 }
 0x4c4   : > { %v1400_v4 = vpop.f32.mrf.mxu0 }
 0x4c6   : > { %v894_v3 = vpop.f32.mrf.mxu0 }
 0x4c7   : > { %905 = vperm.xlu0 %1474, %v1500_v21   ;;  %917 = vrot.lane.b32.xlu1 %v894_v3, %s1568_s28 }
 0x4c8   : > { %v1411_v8 = vpop.f32.mrf.mxu0 }
 0x4ca   : > { %v897_v9 = vpop.f32.mrf.mxu0 }
 0x4cb   : > { %910 = vperm.xlu0 %1474, %v1502_v35   ;;  %1081 = vperm.xlu1 %1473, %v1504_v40  }
 0x4cc   : > { %v1412_v10 = vpop.f32.mrf.mxu0 }
 0x4cf   : > { %919 = vrot.lane.b32.xlu0 %v897_v9, %s1568_s28 }
 0x4d2   : > { %v1070_v19 = vpop.f32.mrf.mxu0 }
 0x4d3   : > { %1086 = vperm.xlu0 %1474, %v1506_v57   ;;  %1093 = vrot.lane.b32.xlu1 %v1070_v19, %s1567_s26 }
 0x4d4   : > { %v1423_v34 = vpop.f32.mrf.mxu0 }
 0x4d6   : > { %v1073_v6 = vpop.f32.mrf.mxu0 }
 0x4d7   : > { %1117 = vperm.xlu1 %1473, %v1508_v38   ;;  %1095 = vrot.lane.b32.xlu0 %v1073_v6, %s1567_s26 }
 0x4d8   : > { %v1424_v44 = vpop.f32.mrf.mxu0 }
 0x4db   : > { %1137 = vperm.xlu1 %1473, %v1512_v32   ;;  %1122 = vperm.xlu0 %1474, %v1510_v46  }
 0x4df   : > { %1157 = vperm.xlu1 %1473, %v1516_v16   ;;  %1142 = vperm.xlu0 %1474, %v1514_v13  }
 0x4e3   : > { %1177 = vperm.xlu1 %1473, %v1520_v22   ;;  %1162 = vperm.xlu0 %1474, %v1518_v18  }
 0x4e7   : > { %1182 = vperm.xlu0 %1474, %v1522_v24  }
 0x531   : > { %v742_v51 = vpop.permute.xlu0 %741 }
 0x532   : > { %v747_v49 = vadd.f32 %v742_v51, %v737_v47 }
 0x534   : > { %750 = vst.msk [vmem:[#allocation4] sm:$0xff] %vm749_vm4, %v747_v49 }
 0x535   : > { %v744_v28 = vpop.permute.xlu0 %743 }
 0x536   : > { %v748_v29 = vadd.f32 %v744_v28, %v738_v25 }
 0x538   : > { %751 = vst.msk [vmem:[#allocation4 + $0x8] sm:$0xff] %vm749_vm4, %v748_v29 }
 0x539   : > { %v918_v20 = vpop.permute.xlu1 %917 }
 0x53b   : > { %v901_v53 = vld [vmem:[#allocation4] sm:$0xff] }
 0x53f   : > { %v902_v30 = vld [vmem:[#allocation4 + $0x8] sm:$0xff] }
 0x542   : > { %v906_v41 = vpop.permute.xlu0 %905 }
 0x543   : > { %v913_v17 = vmul.f32 %v906_v41, %v901_v53 }
 0x545   : > { %v923_v21 = vadd.f32 %v918_v20, %v913_v17 }
 0x546   : > { %v911_v23 = vpop.permute.xlu0 %910  ;;  %v1082_v31 = vpop.permute.xlu1 %1081 }
 0x547   : > { %926 = vst.msk [vmem:[#allocation4] sm:$0xff] %vm925_vm5, %v923_v21  ;;  %v914_v33 = vmul.f32 %v911_v23, %v902_v30 }
 0x54a   : > { %v920_v35 = vpop.permute.xlu0 %919  ;;  %v1094_v54 = vpop.permute.xlu1 %1093 }
 0x54b   : > { %v924_v37 = vadd.f32 %v920_v35, %v914_v33 }
 0x54d   : > { %927 = vst.msk [vmem:[#allocation4 + $0x8] sm:$0xff] %vm925_vm5, %v924_v37 }
 0x54e   : > { %v1077_v50 = vld [vmem:[#allocation4] sm:$0xff]  ;;  %v1087_v36 = vpop.permute.xlu0 %1086 }
 0x54f   : > { %v1089_v52 = vmul.f32 %v1082_v31, %v1077_v50 }
 0x551   : > { %v1099_v39 = vadd.f32 %v1094_v54, %v1089_v52 }
 0x552   : > { %v1096_v56 = vpop.permute.xlu0 %1095  ;;  %v1118_v59 = vpop.permute.xlu1 %1117 }
 0x553   : > { %1102 = vst.msk [vmem:[#allocation4] sm:$0xff] %vm1101_vm6, %v1099_v39 }
 0x554   : > { %v1078_v40 = vld [vmem:[#allocation4 + $0x8] sm:$0xff] }
 0x555   : > { %v1090_v55 = vmul.f32 %v1087_v36, %v1078_v40 }
 0x556   : > { %v1123_v62 = vpop.permute.xlu0 %1122  ;;  %v1138_v1 = vpop.permute.xlu1 %1137 }
 0x557   : > { %v1100_v57 = vadd.f32 %v1096_v56, %v1090_v55 }
 0x559   : > { %1103 = vst.msk [vmem:[#allocation4 + $0x8] sm:$0xff] %vm1101_vm6, %v1100_v57 }
 0x55a   : > { %v1113_v58 = vld [vmem:[#allocation4] sm:$0xff]  ;;  %v1143_v3 = vpop.permute.xlu0 %1142  ;;  %v1158_v7 = vpop.permute.xlu1 %1157 }
 0x55b   : > { %v1125_v60 = vmul.f32 %v1118_v59, %v1113_v58 }
 0x55d   : > { %1127 = vst.msk [vmem:[#allocation4] sm:$0xff] %vm414_vm1, %v1125_v60 }
 0x55e   : > { %v1163_v10 = vpop.permute.xlu0 %1162  ;;  %v1178_v15 = vpop.permute.xlu1 %1177 }
 0x560   : > { %v1114_v61 = vld [vmem:[#allocation4 + $0x8] sm:$0xff] }
 0x561   : > { %v1126_v63 = vmul.f32 %v1123_v62, %v1114_v61 }
 0x562   : > { %v1183_v34 = vpop.permute.xlu0 %1182 }
 0x563   : > { %1128 = vst.msk [vmem:[#allocation4 + $0x8] sm:$0xff] %vm414_vm1, %v1126_v63 }
 0x564   : > { %v1133_v0 = vld [vmem:[#allocation4] sm:$0xff] }
 0x565   : > { %v1145_v2 = vmul.f32 %v1138_v1, %v1133_v0 }
 0x567   : > { %1147 = vst.msk [vmem:[#allocation4] sm:$0xff] %vm749_vm4, %v1145_v2 }
 0x56a   : > { %v1134_v4 = vld [vmem:[#allocation4 + $0x8] sm:$0xff] }
 0x56b   : > { %v1146_v5 = vmul.f32 %v1143_v3, %v1134_v4 }
 0x56d   : > { %1148 = vst.msk [vmem:[#allocation4 + $0x8] sm:$0xff] %vm749_vm4, %v1146_v5 }
 0x56e   : > { %v1153_v8 = vld [vmem:[#allocation4] sm:$0xff] }
 0x56f   : > { %v1165_v9 = vmul.f32 %v1158_v7, %v1153_v8 }
 0x571   : > { %1167 = vst.msk [vmem:[#allocation4] sm:$0xff] %vm925_vm5, %v1165_v9 }
 0x574   : > { %v1154_v11 = vld [vmem:[#allocation4 + $0x8] sm:$0xff] }
 0x575   : > { %v1166_v12 = vmul.f32 %v1163_v10, %v1154_v11 }
 0x577   : > { %1168 = vst.msk [vmem:[#allocation4 + $0x8] sm:$0xff] %vm925_vm5, %v1166_v12 }
 0x578   : > { %v1173_v14 = vld [vmem:[#allocation4] sm:$0xff] }
 0x579   : > { %v1185_v19 = vmul.f32 %v1178_v15, %v1173_v14 }
 0x57b   : > { %1187 = vst.msk [vmem:[#allocation4] sm:$0xff] %vm1101_vm6, %v1185_v19 }
 0x57e   : > { %v1174_v27 = vld [vmem:[#allocation4 + $0x8] sm:$0xff] }
 0x57f   : > { %v1186_v38 = vmul.f32 %v1183_v34, %v1174_v27 }
 0x581   : > { %1188 = vst.msk [vmem:[#allocation4 + $0x8] sm:$0xff] %vm1101_vm6, %v1186_v38 }
 0x582   : > { %v1189_v6 = vld [vmem:[#allocation4] sm:$0xff] }
 0x583   : > { %1191 = vst [vmem:[%s379_s6] sm:$0xff] %v1189_v6 }
 0x588   : > { %v1190_v43 = vld [vmem:[#allocation4 + $0x8] sm:$0xff] }
 0x589   : > { %1192 = vst [vmem:[%s379_s6 + $0x8] sm:$0xff] %v1190_v43 }
 0x58a PF: > { %s13_s16 = sadd.s32 1, %s1561_s16   ;;  %s1965_s12 = smov %s1549_s13 }
 0x58b   : > { %p10_p10 = scmp.ge.s32.totalorder %s13_s16, 4   ;;  %s1966_s13 = smov %s1629_s21 }
 0x58c   : > { %s1967_s14 = smov %s1557_s15  ;;  %s1968_s15 = smov %s1970_s17 }
 0x58d   :  { %12 = sbr.rel (!%p10_p10) target bundleno = 3 (0x3), region = 211 }

// kernel: transformer_sentence_encoder_layer.9
= control target key start
LH: loop header
LB: loop body
LE: loop exit
PB: predicated region body
PF: predicated region fallthrough
CT: control target
= control target key end

     0   :  { %s530_s1 = inlined_call_operand.vmem [shape: bf16[256,128], index: 1, kind: input, shape index: {}]   ;;  %s531_s0 = inlined_call_operand.vmem [shape: f32[32,256], index: 0, kind: input, shape index: {}]   ;;  %s532_s2 = inlined_call_operand.vmem [shape: f32[1,128], index: 2, kind: input, shape index: {}]   ;;  %s533_s3 = inlined_call_operand.vmem [shape: f32[32,128], index: 3, kind: input, shape index: {}]   ;;  %s534_s4 = inlined_call_operand.vmem [shape: f32[1,128], index: 4, kind: input, shape index: {}]   ;;  %s535_s5 = inlined_call_operand.vmem [shape: f32[1,128], index: 5, kind: input, shape index: {}]   ;;  %s536_s6 = inlined_call_operand.vmem [shape: f32[32,128], index: 6, kind: output, shape index: {}]  }
   0x1   :  { %v366_v0 = vld [vmem:[%s530_s1 + $0x78] sm:$0xff]   ;;  %v368_v2 = vld [vmem:[%s530_s1 + $0x70] sm:$0xff]   ;;  %v370_v4 = vld [vmem:[%s530_s1 + $0x68] sm:$0xff]  }
   0x2   :  { %v367_v1 = vld [vmem:[%s530_s1 + $0x38] sm:$0xff]   ;;  %322 = vmatprep.subr.bf16.mxu0 %v366_v0  ;;  %350 = vmatprep.subr.bf16.mxu1 %v366_v0  ;;  %v369_v3 = vld [vmem:[%s530_s1 + $0x30] sm:$0xff]   ;;  %v371_v5 = vld [vmem:[%s530_s1 + $0x28] sm:$0xff]  }
   0x3   :  { %323 = vmatpush3.bf16.msra.mxu0 %v367_v1  ;;  %358 = vmatpush3.bf16.msra.mxu1 %v367_v1  ;;  %v372_v6 = vld [vmem:[%s530_s1 + $0x60] sm:$0xff]   ;;  %v374_v8 = vld [vmem:[%s530_s1 + $0x58] sm:$0xff]   ;;  %v376_v10 = vld [vmem:[%s530_s1 + $0x50] sm:$0xff]  }
   0x4   :  { %324 = vmatprep.subr.bf16.mxu0 %v368_v2  ;;  %351 = vmatprep.subr.bf16.mxu1 %v368_v2  ;;  %v373_v7 = vld [vmem:[%s530_s1 + $0x20] sm:$0xff]   ;;  %v375_v9 = vld [vmem:[%s530_s1 + $0x18] sm:$0xff]   ;;  %v25_v11 = vld [vmem:[%s531_s0 + $0x8] sm:$0xff] }
   0x5   :  { %v27_v12 = vld [vmem:[%s531_s0 + $0x18] sm:$0xff]  ;;  %v29_v13 = vld [vmem:[%s531_s0 + $0x28] sm:$0xff]  ;;  %v377_v17 = vld [vmem:[%s530_s1 + $0x10] sm:$0xff]  }
   0x6   :  { %v33_v14 = vpack.c.bf16 %v27_v12, %v25_v11  ;;  %v31_v15 = vld [vmem:[%s531_s0 + $0x38] sm:$0xff]  ;;  %v378_v18 = vld [vmem:[%s530_s1 + $0x48] sm:$0xff]   ;;  %v380_v20 = vld [vmem:[%s530_s1 + $0x40] sm:$0xff]  }
   0x7   :  { %325 = vmatpush3.bf16.msra.mxu0 %v369_v3  ;;  %359 = vmatpush3.bf16.msra.mxu1 %v369_v3  ;;  %v35_v16 = vpack.c.bf16 %v31_v15, %v29_v13  ;;  %v379_v19 = vld [vmem:[%s530_s1 + $0x8] sm:$0xff]   ;;  %v381_v21 = vld [vmem:[%s530_s1] sm:$0xff]   ;;  %v26_v23 = vld [vmem:[%s531_s0 + $0x10] sm:$0xff] }
   0x8   :  { %326 = vmatprep.subr.bf16.mxu0 %v370_v4  ;;  %352 = vmatprep.subr.bf16.mxu1 %v370_v4  ;;  %v24_v22 = vld [vmem:[%s531_s0] sm:$0xff]  ;;  %v30_v25 = vld [vmem:[%s531_s0 + $0x30] sm:$0xff]  ;;  %v223_v47 = vld [vmem:[%s533_s3 + $0x18] sm:$0xff] }
   0x9   :  { %203 = vmatprep.mubr.bf16.mxu0 %v33_v14  ;;  %211 = vmatprep.mubr.bf16.mxu1 %v35_v16  ;;  %v28_v24 = vld [vmem:[%s531_s0 + $0x20] sm:$0xff]  ;;  %v32_v26 = vpack.c.bf16 %v26_v23, %v24_v22  ;;  %v222_v37 = vld [vmem:[%s533_s3 + $0x10] sm:$0xff]  ;;  %v221_v48 = vld [vmem:[%s533_s3 + $0x8] sm:$0xff] }
   0xa   :  { %v34_v27 = vpack.c.bf16 %v30_v25, %v28_v24  ;;  %v303_v30 = vld [vmem:[%s532_s2] ss:$0 sm:$0xff] }
   0xb   :  { %327 = vmatpush3.bf16.msra.mxu0 %v371_v5  ;;  %360 = vmatpush3.bf16.msra.mxu1 %v371_v5  ;;  %v220_v38 = vld [vmem:[%s533_s3] sm:$0xff] }
   0xc   :  { %328 = vmatprep.subr.bf16.mxu0 %v372_v6  ;;  %353 = vmatprep.subr.bf16.mxu1 %v372_v6 }
   0xf   :  { %329 = vmatpush3.bf16.msra.mxu0 %v373_v7  ;;  %361 = vmatpush3.bf16.msra.mxu1 %v373_v7 }
  0x10   :  { %330 = vmatprep.subr.bf16.mxu0 %v374_v8  ;;  %354 = vmatprep.subr.bf16.mxu1 %v374_v8 }
  0x13   :  { %331 = vmatpush3.bf16.msra.mxu0 %v375_v9  ;;  %362 = vmatpush3.bf16.msra.mxu1 %v375_v9 }
  0x14   :  { %332 = vmatprep.subr.bf16.mxu0 %v376_v10  ;;  %355 = vmatprep.subr.bf16.mxu1 %v376_v10 }
  0x17   :  { %333 = vmatpush3.bf16.msra.mxu0 %v377_v17  ;;  %363 = vmatpush3.bf16.msra.mxu1 %v377_v17 }
  0x18   :  { %334 = vmatprep.subr.bf16.mxu0 %v378_v18  ;;  %356 = vmatprep.subr.bf16.mxu1 %v378_v18  ;;  %v320_v18 = vld [vmem:[%s534_s4] ss:$0 sm:$0xff] }
  0x1b   :  { %335 = vmatpush3.bf16.msra.mxu0 %v379_v19  ;;  %364 = vmatpush3.bf16.msra.mxu1 %v379_v19 }
  0x1c   :  { %336 = vmatprep.subr.bf16.mxu0 %v380_v20  ;;  %357 = vmatprep.subr.bf16.mxu1 %v380_v20  ;;  %v321_v20 = vld [vmem:[%s535_s5] ss:$0 sm:$0xff] }
  0x1f   :  { %337 = vmatpush3.bf16.msra.mxu0 %v381_v21  ;;  %365 = vmatpush3.bf16.msra.mxu1 %v381_v21 }
  0x22   :  { %204 = vmatmul.mubr.bf16.vlgmr.msra.gmra.mxu0 %v32_v26  ;;  %212 = vmatmul.mubr.bf16.vlgmr.msra.gmra.mxu1 %v34_v27 }
  0xe2   :  { %v338_v28 = vpop.f32.mrf.mxu0  ;;  %v344_v29 = vpop.f32.mrf.mxu1 }
  0xe4   :  { %v339_v31 = vpop.f32.mrf.mxu0  ;;  %v345_v32 = vpop.f32.mrf.mxu1 }
  0xe5   :  { %v340_v33 = vadd.f32 %v339_v31, %v338_v28  ;;  %v346_v34 = vadd.f32 %v345_v32, %v344_v29 }
  0xe6   :  { %v341_v35 = vpop.f32.mrf.mxu0  ;;  %v347_v36 = vpop.f32.mrf.mxu1 }
  0xe7   :  { %v206_v39 = vadd.f32 %v340_v33, %v303_v30  ;;  %v214_v40 = vadd.f32 %v346_v34, %v303_v30 }
  0xe8   :  { %v342_v41 = vpop.f32.mrf.mxu0  ;;  %v348_v42 = vpop.f32.mrf.mxu1 }
  0xe9   :  { %v343_v43 = vadd.f32 %v342_v41, %v341_v35  ;;  %v349_v44 = vadd.f32 %v348_v42, %v347_v36  ;;  %v226_v45 = vadd.f32 %v222_v37, %v214_v40  ;;  %v224_v46 = vadd.f32 %v220_v38, %v206_v39 }
  0xeb   :  { %v209_v49 = vadd.f32 %v343_v43, %v303_v30  ;;  %v217_v50 = vadd.f32 %v349_v44, %v303_v30  ;;  %232 = vadd.xlane.f32.xlu1 %v226_v45  ;;  %228 = vadd.xlane.f32.xlu0 %v224_v46 }
  0xed   :  { %v227_v51 = vadd.f32 %v223_v47, %v217_v50  ;;  %v225_v52 = vadd.f32 %v221_v48, %v209_v49 }
  0xef   :  { %234 = vadd.xlane.f32.xlu1 %v227_v51  ;;  %230 = vadd.xlane.f32.xlu0 %v225_v52 }
 0x174   :  { %v233_v53 = vpop.xlane.xlu1 %232  ;;  %v229_v54 = vpop.xlane.xlu0 %228 }
 0x175   :  { %v239_v55 = vmul.f32 0.0078125, %v233_v53  ;;  %v237_v56 = vmul.f32 0.0078125, %v229_v54 }
 0x177   :  { %v241_v57 = vsub.f32 %v224_v46, %v237_v56  ;;  %v243_v60 = vsub.f32 %v226_v45, %v239_v55 }
 0x178   :  { %v235_v58 = vpop.xlane.xlu1 %234  ;;  %v231_v59 = vpop.xlane.xlu0 %230 }
 0x179   :  { %v240_v61 = vmul.f32 0.0078125, %v235_v58  ;;  %v238_v62 = vmul.f32 0.0078125, %v231_v59  ;;  %v245_v63 = vmul.f32 %v241_v57, %v241_v57  ;;  %v247_v2 = vmul.f32 %v243_v60, %v243_v60 }
 0x17b   :  { %v242_v0 = vsub.f32 %v225_v52, %v238_v62  ;;  %249 = vadd.xlane.f32.xlu0 %v245_v63  ;;  %v244_v1 = vsub.f32 %v227_v51, %v240_v61 }
 0x17d   :  { %v246_v3 = vmul.f32 %v242_v0, %v242_v0  ;;  %v248_v4 = vmul.f32 %v244_v1, %v244_v1 }
 0x17f   :  { %253 = vadd.xlane.f32.xlu0 %v247_v2  ;;  %251 = vadd.xlane.f32.xlu1 %v246_v3 }
 0x183   :  { %255 = vadd.xlane.f32.xlu1 %v248_v4 }
 0x204   :  { %v250_v5 = vpop.xlane.xlu0 %249 }
 0x205   :  { %v257_v6 = vmul.f32 0.0078125, %v250_v5 }
 0x207   :  { %v261_v7 = vadd.f32 1e-05, %v257_v6 }
 0x208   :  { %v252_v8 = vpop.xlane.xlu1 %251  ;;  %v254_v9 = vpop.xlane.xlu0 %253 }
 0x209   :  { %382 = vrsqrt.f32 %v261_v7  ;;  %v258_v10 = vmul.f32 0.0078125, %v252_v8  ;;  %v259_v11 = vmul.f32 0.0078125, %v254_v9 }
 0x20b   :  { %v262_v12 = vadd.f32 1e-05, %v258_v10  ;;  %v263_v13 = vadd.f32 1e-05, %v259_v11 }
 0x20c   :  { %v256_v14 = vpop.xlane.xlu1 %255 }
 0x20d   :  { %384 = vrsqrt.f32 %v262_v12  ;;  %v260_v15 = vmul.f32 0.0078125, %v256_v14 }
 0x20e   :  { %386 = vrsqrt.f32 %v263_v13 }
 0x20f   :  { %v264_v16 = vadd.f32 1e-05, %v260_v15 }
 0x211   :  { %388 = vrsqrt.f32 %v264_v16 }
 0x216   :  { %v383_v17 = vpop.eup %382 }
 0x217   :  { %v269_v19 = vmul.f32 %v383_v17, %v241_v57 }
 0x219   :  { %v280_v21 = vmul.f32 %v320_v18, %v269_v19 }
 0x21a   :  { %v385_v22 = vpop.eup %384 }
 0x21b   :  { %v387_v23 = vpop.eup %386  ;;  %v291_v24 = vadd.f32 %v321_v20, %v280_v21  ;;  %v270_v25 = vmul.f32 %v385_v22, %v242_v0 }
 0x21c   :  { %v271_v26 = vmul.f32 %v387_v23, %v243_v60 }
 0x21d   :  { %295 = vst [vmem:[%s536_s6] sm:$0xff] %v291_v24  ;;  %v281_v27 = vmul.f32 %v320_v18, %v270_v25 }
 0x21e   :  { %v389_v28 = vpop.eup %388  ;;  %v282_v29 = vmul.f32 %v320_v18, %v271_v26 }
 0x21f   :  { %v292_v30 = vadd.f32 %v321_v20, %v281_v27  ;;  %v272_v31 = vmul.f32 %v389_v28, %v244_v1 }
 0x220   :  { %v293_v32 = vadd.f32 %v321_v20, %v282_v29 }
 0x221   :  { %296 = vst [vmem:[%s536_s6 + $0x8] sm:$0xff] %v292_v30  ;;  %v283_v33 = vmul.f32 %v320_v18, %v272_v31 }
 0x222   :  { %297 = vst [vmem:[%s536_s6 + $0x10] sm:$0xff] %v293_v32 }
 0x223   :  { %v294_v34 = vadd.f32 %v321_v20, %v283_v33 }
 0x225   :  { %298 = vst [vmem:[%s536_s6 + $0x18] sm:$0xff] %v294_v34 }

</bundles_post_ra>
